<compile_context>
chip_gen: v6e
topology: v6e:2x2x1
jax: 0.10.0
libtpu: 0.0.40
codegen_flags: <defaults>
</compile_context>

<pallas_src>
import functools

import jax
import jax.numpy as jnp
from jax.experimental import pallas as pl
from jax.experimental.pallas import tpu as pltpu


# ------------------------------ Pallas kernel ------------------------------

def _res2_fused_kernel(xz_ref, v_ref, w1_ref, w2_ref,
                       g1_ref, b1_ref, g2_ref, b2_ref,
                       o_ref, slab1_ref, slab2_ref, y1z_ref,
                       *, offsets, pad_f, mk, inv_m, eps, mm_dtype):
    """conv1 + BN1 + ReLU + conv2 + BN2, entirely in VMEM.

    Activations are channel-major [C, pad_f + Mk + pad_f] over a spatially
    zero-padded, flattened N*(H+2p)*(W+2p) axis (lane-rounded to Mk).
    Each conv is a single matmul: [Cout, 9*Cin] x stacked slab [9*Cin, Mk].
    """
    cin = xz_ref.shape[0]
    c1 = y1z_ref.shape[0]
    v = v_ref[...]                      # [1, Mk] validity mask (f32 0/1)

    def stack(src_ref, slab_ref, c):
        # Gather the 9 shifted tap views (already VMEM-resident) into one
        # stacked [9*C, Mk] slab so the conv is a single MXU matmul.
        for t, off in enumerate(offsets):
            slab_ref[t * c:(t + 1) * c, :] = (
                src_ref[:, pad_f + off:pad_f + off + mk].astype(mm_dtype))

    def bn(x, g, b):
        # Training-mode BatchNorm over the valid columns only; two-pass
        # (mean, then centered sum of squares) for numerical robustness.
        mean = jnp.sum(x * v, axis=1, keepdims=True) * inv_m
        cen = (x - mean) * v            # centered; zero at invalid columns
        var = jnp.sum(cen * cen, axis=1, keepdims=True) * inv_m
        return cen * (jax.lax.rsqrt(var + eps) * g) + b

    # conv1 (one matmul) -> bn1 -> relu; re-mask so padding columns are zero.
    stack(xz_ref, slab1_ref, cin)
    h1 = jnp.dot(w1_ref[...], slab1_ref[...],
                 preferred_element_type=jnp.float32)
    y1 = jnp.maximum(bn(h1, g1_ref[...], b1_ref[...]), 0.0) * v

    # Stage y1 for conv2's shifted taps: zero ONLY the two halo strips and
    # store the center once (no redundant full-scratch zeroing).
    y1z_ref[:, :pad_f] = jnp.zeros((c1, pad_f), y1z_ref.dtype)
    y1z_ref[:, pad_f + mk:] = jnp.zeros((c1, pad_f), y1z_ref.dtype)
    y1z_ref[:, pad_f:pad_f + mk] = y1

    # conv2 (one matmul) -> bn2 ; lane-aligned [C2, Mk] output store.
    stack(y1z_ref, slab2_ref, c1)
    h2 = jnp.dot(w2_ref[...], slab2_ref[...],
                 preferred_element_type=jnp.float32)
    o_ref[...] = bn(h2, g2_ref[...], b2_ref[...])


# ------------------------------- JAX wrapper --------------------------------

@functools.partial(jax.jit,
                   static_argnames=("kernel_size", "padding", "eps",
                                    "mm_dtype"))
def res2_forward(x_nchw, w1, g1, be1, w2, g2, be2, *, kernel_size, padding,
                 eps=1e-5, mm_dtype=jnp.float32):
    """Fused Res2 forward (conv biases intentionally omitted: cancelled by
    training-mode BatchNorm)."""
    n, cin, h, w = x_nchw.shape
    c1 = w1.shape[0]
    c2 = w2.shape[0]
    k = kernel_size
    p = (k - 1) // 2
    assert k % 2 == 1 and padding == p, (
        "fused flat-shift kernel supports stride-1 'same' convs only")

    hp, wp = h + 2 * p, w + 2 * p
    mp = n * hp * wp                      # padded-layout column count
    mk = ((mp + 127) // 128) * 128        # lane-rounded kernel column count
    m = n * h * w                         # true valid count for BN
    pad_f = p * wp + p                    # max |di*(W+2p) + dj|

    # NCHW -> spatially zero-padded, channel-major flat [Cin, Mp], then
    # end-padded for the shifted tap reads and lane-rounded to Mk.
    x_pad = jnp.pad(x_nchw, ((0, 0), (0, 0), (p, p), (p, p)))
    x_cm = jnp.transpose(x_pad, (1, 0, 2, 3)).reshape(cin, mp)
    xz = jnp.pad(x_cm, ((0, 0), (pad_f, pad_f + (mk - mp)))).astype(mm_dtype)

    # Single validity mask: 1 inside the images, 0 at spatial padding and at
    # the lane-rounding tail.  (Replaces the 9 per-tap masks.)
    idx = jnp.arange(mk, dtype=jnp.int32)
    col = idx % wp
    row = (idx // wp) % hp
    v = ((idx < mp) & (col >= p) & (col < w + p)
         & (row >= p) & (row < h + p)).astype(jnp.float32).reshape(1, mk)

    # Per-tap flat shifts; PyTorch OIHW weights -> [Cout, k*k*Cin], matching
    # the tap-major / channel-minor stacked-slab row ordering.
    offsets = tuple((ti - p) * wp + (tj - p)
                    for ti in range(k) for tj in range(k))
    w1_2d = jnp.transpose(w1, (0, 2, 3, 1)).reshape(c1, k * k * cin)
    w2_2d = jnp.transpose(w2, (0, 2, 3, 1)).reshape(c2, k * k * c1)
    w1_2d = w1_2d.astype(mm_dtype)
    w2_2d = w2_2d.astype(mm_dtype)

    kernel = functools.partial(
        _res2_fused_kernel, offsets=offsets, pad_f=pad_f, mk=mk,
        inv_m=1.0 / m, eps=eps, mm_dtype=mm_dtype)

    out_cm = pl.pallas_call(
        kernel,
        out_shape=jax.ShapeDtypeStruct((c2, mk), jnp.float32),
        grid=(1,),
        in_specs=[
            pl.BlockSpec(xz.shape, lambda i: (0, 0)),
            pl.BlockSpec(v.shape, lambda i: (0, 0)),
            pl.BlockSpec(w1_2d.shape, lambda i: (0, 0)),
            pl.BlockSpec(w2_2d.shape, lambda i: (0, 0)),
            pl.BlockSpec((c1, 1), lambda i: (0, 0)),
            pl.BlockSpec((c1, 1), lambda i: (0, 0)),
            pl.BlockSpec((c2, 1), lambda i: (0, 0)),
            pl.BlockSpec((c2, 1), lambda i: (0, 0)),
        ],
        out_specs=pl.BlockSpec((c2, mk), lambda i: (0, 0)),
        scratch_shapes=[
            pltpu.VMEM((k * k * cin, mk), mm_dtype),          # stacked slab 1
            pltpu.VMEM((k * k * c1, mk), mm_dtype),           # stacked slab 2
            pltpu.VMEM((c1, mk + 2 * pad_f), jnp.float32),    # padded y1
        ],
        compiler_params=pltpu.CompilerParams(
            dimension_semantics=("arbitrary",)),
    )(xz, v, w1_2d, w2_2d,
      g1.reshape(c1, 1), be1.reshape(c1, 1),
      g2.reshape(c2, 1), be2.reshape(c2, 1))

    # [C2, Mk] -> drop lane-rounding tail / spatial padding -> NCHW.
    out = out_cm[:, :mp].reshape(c2, n, hp, wp)[:, :, p:p + h, p:p + w]
    return jnp.transpose(out, (1, 0, 2, 3))


# ---------------------------- pure-JAX reference ----------------------------

def ref_forward(x_nchw, w1, b1, g1, be1, w2, b2, g2, be2, padding, eps=1e-5):
    def conv(x, wt, b):
        y = jax.lax.conv_general_dilated(
            x, wt, window_strides=(1, 1),
            padding=[(padding, padding)] * 2,
            dimension_numbers=("NCHW", "OIHW", "NCHW"))
        return y + b[None, :, None, None]

    def bn(x, g, be):
        mean = jnp.mean(x, axis=(0, 2, 3), keepdims=True)
        var = jnp.mean((x - mean) ** 2, axis=(0, 2, 3), keepdims=True)
        return ((x - mean) * jax.lax.rsqrt(var + eps)
                * g[None, :, None, None] + be[None, :, None, None])

    y = jax.nn.relu(bn(conv(x_nchw, w1, b1), g1, be1))
    return bn(conv(y, w2, b2), g2, be2)


# ----------------------------------- main ------------------------------------

if __name__ == "__main__":
    in_channels, inter_channels = 4, 8
    ksize, pad = 3, 1
    N, H, W = 2, 16, 16

    key = jax.random.PRNGKey(0)
    ks = jax.random.split(key, 5)
    x = jax.random.normal(ks[0], (N, in_channels, H, W), jnp.float32)

    # deterministic parameter init (PyTorch OIHW conv weight layout)
    w1 = jax.random.normal(ks[1], (inter_channels, in_channels, ksize, ksize),
                           jnp.float32) * 0.1
    b1 = jax.random.normal(ks[2], (inter_channels,), jnp.float32) * 0.1
    w2 = jax.random.normal(ks[3], (in_channels, inter_channels, ksize, ksize),
                           jnp.float32) * 0.1
    b2 = jax.random.normal(ks[4], (in_channels,), jnp.float32) * 0.1
    g1 = 1.0 + 0.1 * jnp.arange(inter_channels, dtype=jnp.float32)
    be1 = 0.05 * jnp.arange(inter_channels, dtype=jnp.float32)
    g2 = 1.0 + 0.1 * jnp.arange(in_channels, dtype=jnp.float32)
    be2 = -0.05 * jnp.arange(in_channels, dtype=jnp.float32)

    # Conv biases b1/b2 are deliberately NOT given to the Pallas path: a
    # per-channel constant before training-mode BatchNorm cancels exactly.
    # The reference keeps them, so the check below validates the cancellation.
    out = res2_forward(x, w1, g1, be1, w2, g2, be2,
                       kernel_size=ksize, padding=pad)
    out = jax.block_until_ready(out)

    ref = ref_forward(x, w1, b1, g1, be1, w2, b2, g2, be2, pad)
    assert out.shape == ref.shape == (N, in_channels, H, W)
    max_err = float(jnp.max(jnp.abs(out - ref)))
    assert jnp.allclose(out, ref, rtol=1e-4, atol=1e-4), max_err

    print("KERNEL_OK")
</pallas_src>

<mosaic_0001>
module attributes {stable_mosaic.version = 11 : i64} {
  func.func @_res2_fused_kernel(%arg0: i32, %arg1: memref<4x806xf32, #tpu.memory_space<vmem>>, %arg2: memref<1x768xf32, #tpu.memory_space<vmem>>, %arg3: memref<8x36xf32, #tpu.memory_space<vmem>>, %arg4: memref<4x72xf32, #tpu.memory_space<vmem>>, %arg5: memref<8x1xf32, #tpu.memory_space<vmem>>, %arg6: memref<8x1xf32, #tpu.memory_space<vmem>>, %arg7: memref<4x1xf32, #tpu.memory_space<vmem>>, %arg8: memref<4x1xf32, #tpu.memory_space<vmem>>, %arg9: memref<4x768xf32, #tpu.memory_space<vmem>>, %arg10: memref<36x768xf32, #tpu.memory_space<vmem>>, %arg11: memref<72x768xf32, #tpu.memory_space<vmem>>, %arg12: memref<8x806xf32, #tpu.memory_space<vmem>>) attributes {dimension_semantics = [#tpu.dimension_semantics<arbitrary>], iteration_bounds = array<i64: 1>, scalar_prefetch = 0 : i64, scratch_operands = 3 : i64, tpu.core_type = #tpu.core_type<tc>, window_params = [{pipeline_mode = #tpu.pipeline_mode<synchronous>, transform_indices = @transform_0, window_bounds = array<i64: 4, 806>}, {pipeline_mode = #tpu.pipeline_mode<synchronous>, transform_indices = @transform_1, window_bounds = array<i64: 1, 768>}, {pipeline_mode = #tpu.pipeline_mode<synchronous>, transform_indices = @transform_2, window_bounds = array<i64: 8, 36>}, {pipeline_mode = #tpu.pipeline_mode<synchronous>, transform_indices = @transform_3, window_bounds = array<i64: 4, 72>}, {pipeline_mode = #tpu.pipeline_mode<synchronous>, transform_indices = @transform_4, window_bounds = array<i64: 8, 1>}, {pipeline_mode = #tpu.pipeline_mode<synchronous>, transform_indices = @transform_5, window_bounds = array<i64: 8, 1>}, {pipeline_mode = #tpu.pipeline_mode<synchronous>, transform_indices = @transform_6, window_bounds = array<i64: 4, 1>}, {pipeline_mode = #tpu.pipeline_mode<synchronous>, transform_indices = @transform_7, window_bounds = array<i64: 4, 1>}, {pipeline_mode = #tpu.pipeline_mode<synchronous>, transform_indices = @transform_8, window_bounds = array<i64: 4, 768>}]} {
    %c0 = arith.constant 0 : index
    %c0_0 = arith.constant 0 : index
    %0 = vector.load %arg2[%c0, %c0_0] : memref<1x768xf32, #tpu.memory_space<vmem>>, vector<1x768xf32>
    %c0_1 = arith.constant 0 : index
    %c0_2 = arith.constant 0 : index
    %1 = vector.load %arg1[%c0_1, %c0_2] : memref<4x806xf32, #tpu.memory_space<vmem>>, vector<4x768xf32>
    %c0_3 = arith.constant 0 : index
    %c0_4 = arith.constant 0 : index
    %2 = vector.load %arg10[%c0_3, %c0_4] : memref<36x768xf32, #tpu.memory_space<vmem>>, vector<4x768xf32>
    tpu.vector_store %arg10[%c0_3, %c0_4], %1 {strides = array<i32>} : memref<36x768xf32, #tpu.memory_space<vmem>>, vector<4x768xf32>,
    %c0_5 = arith.constant 0 : index
    %c1 = arith.constant 1 : index
    %3 = vector.load %arg1[%c0_5, %c1] : memref<4x806xf32, #tpu.memory_space<vmem>>, vector<4x768xf32>
    %c4 = arith.constant 4 : index
    %c0_6 = arith.constant 0 : index
    %4 = vector.load %arg10[%c4, %c0_6] : memref<36x768xf32, #tpu.memory_space<vmem>>, vector<4x768xf32>
    tpu.vector_store %arg10[%c4, %c0_6], %3 {strides = array<i32>} : memref<36x768xf32, #tpu.memory_space<vmem>>, vector<4x768xf32>,
    %c0_7 = arith.constant 0 : index
    %c2 = arith.constant 2 : index
    %5 = vector.load %arg1[%c0_7, %c2] : memref<4x806xf32, #tpu.memory_space<vmem>>, vector<4x768xf32>
    %c8 = arith.constant 8 : index
    %c0_8 = arith.constant 0 : index
    %6 = vector.load %arg10[%c8, %c0_8] : memref<36x768xf32, #tpu.memory_space<vmem>>, vector<4x768xf32>
    tpu.vector_store %arg10[%c8, %c0_8], %5 {strides = array<i32>} : memref<36x768xf32, #tpu.memory_space<vmem>>, vector<4x768xf32>,
    %c0_9 = arith.constant 0 : index
    %c18 = arith.constant 18 : index
    %7 = vector.load %arg1[%c0_9, %c18] : memref<4x806xf32, #tpu.memory_space<vmem>>, vector<4x768xf32>
    %c12 = arith.constant 12 : index
    %c0_10 = arith.constant 0 : index
    %8 = vector.load %arg10[%c12, %c0_10] : memref<36x768xf32, #tpu.memory_space<vmem>>, vector<4x768xf32>
    tpu.vector_store %arg10[%c12, %c0_10], %7 {strides = array<i32>} : memref<36x768xf32, #tpu.memory_space<vmem>>, vector<4x768xf32>,
    %c0_11 = arith.constant 0 : index
    %c19 = arith.constant 19 : index
    %9 = vector.load %arg1[%c0_11, %c19] : memref<4x806xf32, #tpu.memory_space<vmem>>, vector<4x768xf32>
    %c16 = arith.constant 16 : index
    %c0_12 = arith.constant 0 : index
    %10 = vector.load %arg10[%c16, %c0_12] : memref<36x768xf32, #tpu.memory_space<vmem>>, vector<4x768xf32>
    tpu.vector_store %arg10[%c16, %c0_12], %9 {strides = array<i32>} : memref<36x768xf32, #tpu.memory_space<vmem>>, vector<4x768xf32>,
    %c0_13 = arith.constant 0 : index
    %c20 = arith.constant 20 : index
    %11 = vector.load %arg1[%c0_13, %c20] : memref<4x806xf32, #tpu.memory_space<vmem>>, vector<4x768xf32>
    %c20_14 = arith.constant 20 : index
    %c0_15 = arith.constant 0 : index
    %12 = vector.load %arg10[%c20_14, %c0_15] : memref<36x768xf32, #tpu.memory_space<vmem>>, vector<4x768xf32>
    tpu.vector_store %arg10[%c20_14, %c0_15], %11 {strides = array<i32>} : memref<36x768xf32, #tpu.memory_space<vmem>>, vector<4x768xf32>,
    %c0_16 = arith.constant 0 : index
    %c36 = arith.constant 36 : index
    %13 = vector.load %arg1[%c0_16, %c36] : memref<4x806xf32, #tpu.memory_space<vmem>>, vector<4x768xf32>
    %c24 = arith.constant 24 : index
    %c0_17 = arith.constant 0 : index
    %14 = vector.load %arg10[%c24, %c0_17] : memref<36x768xf32, #tpu.memory_space<vmem>>, vector<4x768xf32>
    tpu.vector_store %arg10[%c24, %c0_17], %13 {strides = array<i32>} : memref<36x768xf32, #tpu.memory_space<vmem>>, vector<4x768xf32>,
    %c0_18 = arith.constant 0 : index
    %c37 = arith.constant 37 : index
    %15 = vector.load %arg1[%c0_18, %c37] : memref<4x806xf32, #tpu.memory_space<vmem>>, vector<4x768xf32>
    %c28 = arith.constant 28 : index
    %c0_19 = arith.constant 0 : index
    %16 = vector.load %arg10[%c28, %c0_19] : memref<36x768xf32, #tpu.memory_space<vmem>>, vector<4x768xf32>
    tpu.vector_store %arg10[%c28, %c0_19], %15 {strides = array<i32>} : memref<36x768xf32, #tpu.memory_space<vmem>>, vector<4x768xf32>,
    %c0_20 = arith.constant 0 : index
    %c38 = arith.constant 38 : index
    %17 = vector.load %arg1[%c0_20, %c38] : memref<4x806xf32, #tpu.memory_space<vmem>>, vector<4x768xf32>
    %c32 = arith.constant 32 : index
    %c0_21 = arith.constant 0 : index
    %18 = vector.load %arg10[%c32, %c0_21] : memref<36x768xf32, #tpu.memory_space<vmem>>, vector<4x768xf32>
    tpu.vector_store %arg10[%c32, %c0_21], %17 {strides = array<i32>} : memref<36x768xf32, #tpu.memory_space<vmem>>, vector<4x768xf32>,
    %c0_22 = arith.constant 0 : index
    %c0_23 = arith.constant 0 : index
    %19 = vector.load %arg3[%c0_22, %c0_23] : memref<8x36xf32, #tpu.memory_space<vmem>>, vector<8x36xf32>
    %c0_24 = arith.constant 0 : index
    %c0_25 = arith.constant 0 : index
    %20 = vector.load %arg10[%c0_24, %c0_25] : memref<36x768xf32, #tpu.memory_space<vmem>>, vector<36x768xf32>
    %cst = arith.constant dense<0.000000e+00> : vector<8x768xf32>
    %21 = tpu.matmul %19, %20, %cst {dimension_numbers = #tpu.dot_dimension_numbers<[1], [0], [0], [1], [0, 0, 1, 1], [], []>} : vector<8x36xf32>, vector<36x768xf32>, vector<8x768xf32> -> vector<8x768xf32>
    %c0_26 = arith.constant 0 : index
    %c0_27 = arith.constant 0 : index
    %22 = vector.load %arg5[%c0_26, %c0_27] : memref<8x1xf32, #tpu.memory_space<vmem>>, vector<8x1xf32>
    %c0_28 = arith.constant 0 : index
    %c0_29 = arith.constant 0 : index
    %23 = vector.load %arg6[%c0_28, %c0_29] : memref<8x1xf32, #tpu.memory_space<vmem>>, vector<8x1xf32>
    %24 = vector.broadcast %0 : vector<1x768xf32> to vector<8x768xf32>
    %25 = arith.mulf %21, %24 : vector<8x768xf32>
    %cst_30 = arith.constant dense<0.000000e+00> : vector<8xf32>
    %26 = vector.multi_reduction <add>, %25, %cst_30 [1] : vector<8x768xf32> to vector<8xf32>
    %27 = vector.shape_cast %26 : vector<8xf32> to vector<8x1xf32>
    %cst_31 = arith.constant 0.001953125 : f32
    %28 = vector.broadcast %cst_31 : f32 to vector<8x1xf32>
    %29 = arith.mulf %27, %28 : vector<8x1xf32>
    %30 = vector.broadcast %29 : vector<8x1xf32> to vector<8x768xf32>
    %31 = arith.subf %21, %30 : vector<8x768xf32>
    %32 = vector.broadcast %0 : vector<1x768xf32> to vector<8x768xf32>
    %33 = arith.mulf %31, %32 : vector<8x768xf32>
    %34 = arith.mulf %33, %33 : vector<8x768xf32>
    %cst_32 = arith.constant dense<0.000000e+00> : vector<8xf32>
    %35 = vector.multi_reduction <add>, %34, %cst_32 [1] : vector<8x768xf32> to vector<8xf32>
    %36 = vector.shape_cast %35 : vector<8xf32> to vector<8x1xf32>
    %cst_33 = arith.constant 0.001953125 : f32
    %37 = vector.broadcast %cst_33 : f32 to vector<8x1xf32>
    %38 = arith.mulf %36, %37 : vector<8x1xf32>
    %cst_34 = arith.constant 9.99999974E-6 : f32
    %39 = vector.broadcast %cst_34 : f32 to vector<8x1xf32>
    %40 = arith.addf %38, %39 : vector<8x1xf32>
    %41 = math.rsqrt %40 : vector<8x1xf32>
    %42 = arith.mulf %41, %22 : vector<8x1xf32>
    %43 = vector.broadcast %42 : vector<8x1xf32> to vector<8x768xf32>
    %44 = arith.mulf %33, %43 : vector<8x768xf32>
    %45 = vector.broadcast %23 : vector<8x1xf32> to vector<8x768xf32>
    %46 = arith.addf %44, %45 : vector<8x768xf32>
    %cst_35 = arith.constant 0.000000e+00 : f32
    %47 = vector.broadcast %cst_35 : f32 to vector<8x768xf32>
    %48 = arith.maximumf %46, %47 : vector<8x768xf32>
    %49 = vector.broadcast %0 : vector<1x768xf32> to vector<8x768xf32>
    %50 = arith.mulf %48, %49 : vector<8x768xf32>
    %cst_36 = arith.constant 0.000000e+00 : f32
    %51 = vector.broadcast %cst_36 : f32 to vector<8x19xf32>
    %c0_37 = arith.constant 0 : index
    %c0_38 = arith.constant 0 : index
    %52 = vector.load %arg12[%c0_37, %c0_38] : memref<8x806xf32, #tpu.memory_space<vmem>>, vector<8x19xf32>
    tpu.vector_store %arg12[%c0_37, %c0_38], %51 {strides = array<i32>} : memref<8x806xf32, #tpu.memory_space<vmem>>, vector<8x19xf32>,
    %cst_39 = arith.constant 0.000000e+00 : f32
    %53 = vector.broadcast %cst_39 : f32 to vector<8x19xf32>
    %c0_40 = arith.constant 0 : index
    %c787 = arith.constant 787 : index
    %54 = vector.load %arg12[%c0_40, %c787] : memref<8x806xf32, #tpu.memory_space<vmem>>, vector<8x19xf32>
    tpu.vector_store %arg12[%c0_40, %c787], %53 {strides = array<i32>} : memref<8x806xf32, #tpu.memory_space<vmem>>, vector<8x19xf32>,
    %c0_41 = arith.constant 0 : index
    %c19_42 = arith.constant 19 : index
    %55 = vector.load %arg12[%c0_41, %c19_42] : memref<8x806xf32, #tpu.memory_space<vmem>>, vector<8x768xf32>
    tpu.vector_store %arg12[%c0_41, %c19_42], %50 {strides = array<i32>} : memref<8x806xf32, #tpu.memory_space<vmem>>, vector<8x768xf32>,
    %c0_43 = arith.constant 0 : index
    %c0_44 = arith.constant 0 : index
    %56 = vector.load %arg12[%c0_43, %c0_44] : memref<8x806xf32, #tpu.memory_space<vmem>>, vector<8x768xf32>
    %c0_45 = arith.constant 0 : index
    %c0_46 = arith.constant 0 : index
    %57 = vector.load %arg11[%c0_45, %c0_46] : memref<72x768xf32, #tpu.memory_space<vmem>>, vector<8x768xf32>
    tpu.vector_store %arg11[%c0_45, %c0_46], %56 {strides = array<i32>} : memref<72x768xf32, #tpu.memory_space<vmem>>, vector<8x768xf32>,
    %c0_47 = arith.constant 0 : index
    %c1_48 = arith.constant 1 : index
    %58 = vector.load %arg12[%c0_47, %c1_48] : memref<8x806xf32, #tpu.memory_space<vmem>>, vector<8x768xf32>
    %c8_49 = arith.constant 8 : index
    %c0_50 = arith.constant 0 : index
    %59 = vector.load %arg11[%c8_49, %c0_50] : memref<72x768xf32, #tpu.memory_space<vmem>>, vector<8x768xf32>
    tpu.vector_store %arg11[%c8_49, %c0_50], %58 {strides = array<i32>} : memref<72x768xf32, #tpu.memory_space<vmem>>, vector<8x768xf32>,
    %c0_51 = arith.constant 0 : index
    %c2_52 = arith.constant 2 : index
    %60 = vector.load %arg12[%c0_51, %c2_52] : memref<8x806xf32, #tpu.memory_space<vmem>>, vector<8x768xf32>
    %c16_53 = arith.constant 16 : index
    %c0_54 = arith.constant 0 : index
    %61 = vector.load %arg11[%c16_53, %c0_54] : memref<72x768xf32, #tpu.memory_space<vmem>>, vector<8x768xf32>
    tpu.vector_store %arg11[%c16_53, %c0_54], %60 {strides = array<i32>} : memref<72x768xf32, #tpu.memory_space<vmem>>, vector<8x768xf32>,
    %c0_55 = arith.constant 0 : index
    %c18_56 = arith.constant 18 : index
    %62 = vector.load %arg12[%c0_55, %c18_56] : memref<8x806xf32, #tpu.memory_space<vmem>>, vector<8x768xf32>
    %c24_57 = arith.constant 24 : index
    %c0_58 = arith.constant 0 : index
    %63 = vector.load %arg11[%c24_57, %c0_58] : memref<72x768xf32, #tpu.memory_space<vmem>>, vector<8x768xf32>
    tpu.vector_store %arg11[%c24_57, %c0_58], %62 {strides = array<i32>} : memref<72x768xf32, #tpu.memory_space<vmem>>, vector<8x768xf32>,
    %c0_59 = arith.constant 0 : index
    %c19_60 = arith.constant 19 : index
    %64 = vector.load %arg12[%c0_59, %c19_60] : memref<8x806xf32, #tpu.memory_space<vmem>>, vector<8x768xf32>
    %c32_61 = arith.constant 32 : index
    %c0_62 = arith.constant 0 : index
    %65 = vector.load %arg11[%c32_61, %c0_62] : memref<72x768xf32, #tpu.memory_space<vmem>>, vector<8x768xf32>
    tpu.vector_store %arg11[%c32_61, %c0_62], %64 {strides = array<i32>} : memref<72x768xf32, #tpu.memory_space<vmem>>, vector<8x768xf32>,
    %c0_63 = arith.constant 0 : index
    %c20_64 = arith.constant 20 : index
    %66 = vector.load %arg12[%c0_63, %c20_64] : memref<8x806xf32, #tpu.memory_space<vmem>>, vector<8x768xf32>
    %c40 = arith.constant 40 : index
    %c0_65 = arith.constant 0 : index
    %67 = vector.load %arg11[%c40, %c0_65] : memref<72x768xf32, #tpu.memory_space<vmem>>, vector<8x768xf32>
    tpu.vector_store %arg11[%c40, %c0_65], %66 {strides = array<i32>} : memref<72x768xf32, #tpu.memory_space<vmem>>, vector<8x768xf32>,
    %c0_66 = arith.constant 0 : index
    %c36_67 = arith.constant 36 : index
    %68 = vector.load %arg12[%c0_66, %c36_67] : memref<8x806xf32, #tpu.memory_space<vmem>>, vector<8x768xf32>
    %c48 = arith.constant 48 : index
    %c0_68 = arith.constant 0 : index
    %69 = vector.load %arg11[%c48, %c0_68] : memref<72x768xf32, #tpu.memory_space<vmem>>, vector<8x768xf32>
    tpu.vector_store %arg11[%c48, %c0_68], %68 {strides = array<i32>} : memref<72x768xf32, #tpu.memory_space<vmem>>, vector<8x768xf32>,
    %c0_69 = arith.constant 0 : index
    %c37_70 = arith.constant 37 : index
    %70 = vector.load %arg12[%c0_69, %c37_70] : memref<8x806xf32, #tpu.memory_space<vmem>>, vector<8x768xf32>
    %c56 = arith.constant 56 : index
    %c0_71 = arith.constant 0 : index
    %71 = vector.load %arg11[%c56, %c0_71] : memref<72x768xf32, #tpu.memory_space<vmem>>, vector<8x768xf32>
    tpu.vector_store %arg11[%c56, %c0_71], %70 {strides = array<i32>} : memref<72x768xf32, #tpu.memory_space<vmem>>, vector<8x768xf32>,
    %c0_72 = arith.constant 0 : index
    %c38_73 = arith.constant 38 : index
    %72 = vector.load %arg12[%c0_72, %c38_73] : memref<8x806xf32, #tpu.memory_space<vmem>>, vector<8x768xf32>
    %c64 = arith.constant 64 : index
    %c0_74 = arith.constant 0 : index
    %73 = vector.load %arg11[%c64, %c0_74] : memref<72x768xf32, #tpu.memory_space<vmem>>, vector<8x768xf32>
    tpu.vector_store %arg11[%c64, %c0_74], %72 {strides = array<i32>} : memref<72x768xf32, #tpu.memory_space<vmem>>, vector<8x768xf32>,
    %c0_75 = arith.constant 0 : index
    %c0_76 = arith.constant 0 : index
    %74 = vector.load %arg4[%c0_75, %c0_76] : memref<4x72xf32, #tpu.memory_space<vmem>>, vector<4x72xf32>
    %c0_77 = arith.constant 0 : index
    %c0_78 = arith.constant 0 : index
    %75 = vector.load %arg11[%c0_77, %c0_78] : memref<72x768xf32, #tpu.memory_space<vmem>>, vector<72x768xf32>
    %cst_79 = arith.constant dense<0.000000e+00> : vector<4x768xf32>
    %76 = tpu.matmul %74, %75, %cst_79 {dimension_numbers = #tpu.dot_dimension_numbers<[1], [0], [0], [1], [0, 0, 1, 1], [], []>} : vector<4x72xf32>, vector<72x768xf32>, vector<4x768xf32> -> vector<4x768xf32>
    %c0_80 = arith.constant 0 : index
    %c0_81 = arith.constant 0 : index
    %77 = vector.load %arg7[%c0_80, %c0_81] : memref<4x1xf32, #tpu.memory_space<vmem>>, vector<4x1xf32>
    %c0_82 = arith.constant 0 : index
    %c0_83 = arith.constant 0 : index
    %78 = vector.load %arg8[%c0_82, %c0_83] : memref<4x1xf32, #tpu.memory_space<vmem>>, vector<4x1xf32>
    %79 = vector.broadcast %0 : vector<1x768xf32> to vector<4x768xf32>
    %80 = arith.mulf %76, %79 : vector<4x768xf32>
    %cst_84 = arith.constant dense<0.000000e+00> : vector<4xf32>
    %81 = vector.multi_reduction <add>, %80, %cst_84 [1] : vector<4x768xf32> to vector<4xf32>
    %82 = vector.shape_cast %81 : vector<4xf32> to vector<4x1xf32>
    %cst_85 = arith.constant 0.001953125 : f32
    %83 = vector.broadcast %cst_85 : f32 to vector<4x1xf32>
    %84 = arith.mulf %82, %83 : vector<4x1xf32>
    %85 = vector.broadcast %84 : vector<4x1xf32> to vector<4x768xf32>
    %86 = arith.subf %76, %85 : vector<4x768xf32>
    %87 = vector.broadcast %0 : vector<1x768xf32> to vector<4x768xf32>
    %88 = arith.mulf %86, %87 : vector<4x768xf32>
    %89 = arith.mulf %88, %88 : vector<4x768xf32>
    %cst_86 = arith.constant dense<0.000000e+00> : vector<4xf32>
    %90 = vector.multi_reduction <add>, %89, %cst_86 [1] : vector<4x768xf32> to vector<4xf32>
    %91 = vector.shape_cast %90 : vector<4xf32> to vector<4x1xf32>
    %cst_87 = arith.constant 0.001953125 : f32
    %92 = vector.broadcast %cst_87 : f32 to vector<4x1xf32>
    %93 = arith.mulf %91, %92 : vector<4x1xf32>
    %cst_88 = arith.constant 9.99999974E-6 : f32
    %94 = vector.broadcast %cst_88 : f32 to vector<4x1xf32>
    %95 = arith.addf %93, %94 : vector<4x1xf32>
    %96 = math.rsqrt %95 : vector<4x1xf32>
    %97 = arith.mulf %96, %77 : vector<4x1xf32>
    %98 = vector.broadcast %97 : vector<4x1xf32> to vector<4x768xf32>
    %99 = arith.mulf %88, %98 : vector<4x768xf32>
    %100 = vector.broadcast %78 : vector<4x1xf32> to vector<4x768xf32>
    %101 = arith.addf %99, %100 : vector<4x768xf32>
    %c0_89 = arith.constant 0 : index
    %c0_90 = arith.constant 0 : index
    %102 = vector.load %arg9[%c0_89, %c0_90] : memref<4x768xf32, #tpu.memory_space<vmem>>, vector<4x768xf32>
    tpu.vector_store %arg9[%c0_89, %c0_90], %101 {strides = array<i32>} : memref<4x768xf32, #tpu.memory_space<vmem>>, vector<4x768xf32>,
    return
  }
  func.func @transform_0(%arg0: i32) -> (i32, i32) {
    %c0_i32 = arith.constant 0 : i32
    %c0_i32_0 = arith.constant 0 : i32
    %c0_i32_1 = arith.constant 0 : i32
    return %c0_i32, %c0_i32_0 : i32, i32
  }
  func.func @transform_1(%arg0: i32) -> (i32, i32) {
    %c0_i32 = arith.constant 0 : i32
    %c0_i32_0 = arith.constant 0 : i32
    %c0_i32_1 = arith.constant 0 : i32
    return %c0_i32, %c0_i32_0 : i32, i32
  }
  func.func @transform_2(%arg0: i32) -> (i32, i32) {
    %c0_i32 = arith.constant 0 : i32
    %c0_i32_0 = arith.constant 0 : i32
    %c0_i32_1 = arith.constant 0 : i32
    return %c0_i32, %c0_i32_0 : i32, i32
  }
  func.func @transform_3(%arg0: i32) -> (i32, i32) {
    %c0_i32 = arith.constant 0 : i32
    %c0_i32_0 = arith.constant 0 : i32
    %c0_i32_1 = arith.constant 0 : i32
    return %c0_i32, %c0_i32_0 : i32, i32
  }
  func.func @transform_4(%arg0: i32) -> (i32, i32) {
    %c0_i32 = arith.constant 0 : i32
    %c0_i32_0 = arith.constant 0 : i32
    %c0_i32_1 = arith.constant 0 : i32
    return %c0_i32, %c0_i32_0 : i32, i32
  }
  func.func @transform_5(%arg0: i32) -> (i32, i32) {
    %c0_i32 = arith.constant 0 : i32
    %c0_i32_0 = arith.constant 0 : i32
    %c0_i32_1 = arith.constant 0 : i32
    return %c0_i32, %c0_i32_0 : i32, i32
  }
  func.func @transform_6(%arg0: i32) -> (i32, i32) {
    %c0_i32 = arith.constant 0 : i32
    %c0_i32_0 = arith.constant 0 : i32
    %c0_i32_1 = arith.constant 0 : i32
    return %c0_i32, %c0_i32_0 : i32, i32
  }
  func.func @transform_7(%arg0: i32) -> (i32, i32) {
    %c0_i32 = arith.constant 0 : i32
    %c0_i32_0 = arith.constant 0 : i32
    %c0_i32_1 = arith.constant 0 : i32
    return %c0_i32, %c0_i32_0 : i32, i32
  }
  func.func @transform_8(%arg0: i32) -> (i32, i32) {
    %c0_i32 = arith.constant 0 : i32
    %c0_i32_0 = arith.constant 0 : i32
    %c0_i32_1 = arith.constant 0 : i32
    return %c0_i32, %c0_i32_0 : i32, i32
  }
}

</mosaic_0001>

<bundles_post_ra>
// kernel: res2_forward.1
= control target key start
LH: loop header
LB: loop body
LE: loop exit
PB: predicated region body
PF: predicated region fallthrough
CT: control target
= control target key end

     0   :  { %s1612_s11 = smov 90   ;;  %s1613_s12 = smov 92   ;;  %v1620_v10 = vmov 0.0   ;;  %vm385_vm0 = vcmask 736256   ;;  %vm296_vm1 = vcmask 752640   ;;  %vm341_vm2 = vcmask 744448   ;;  %s2250_s0 = inlined_call_operand.vmem [shape: f32[4,806], index: 0, kind: input, shape index: {}]   ;;  %s2251_s2 = inlined_call_operand.vmem [shape: f32[8,36], index: 2, kind: input, shape index: {}]   ;;  %s2252_s1 = inlined_call_operand.vmem [shape: f32[1,768], index: 1, kind: input, shape index: {}]   ;;  %s2253_s5 = inlined_call_operand.vmem [shape: f32[8,1], index: 5, kind: input, shape index: {}]   ;;  %s2254_s4 = inlined_call_operand.vmem [shape: f32[8,1], index: 4, kind: input, shape index: {}]   ;;  %s2255_s3 = inlined_call_operand.vmem [shape: f32[4,72], index: 3, kind: input, shape index: {}]   ;;  %s2256_s7 = inlined_call_operand.vmem [shape: f32[4,1], index: 7, kind: input, shape index: {}]   ;;  %s2257_s6 = inlined_call_operand.vmem [shape: f32[4,1], index: 6, kind: input, shape index: {}]   ;;  %s2258_s8 = inlined_call_operand.vmem [shape: f32[4,768], index: 8, kind: output, shape index: {}]  }
   0x1   :  { %v1671_v0 = vld [vmem:[%s2250_s0 + $0x8] sm:$0xff]  ;;  %v360_v1 = vld [vmem:[%s2250_s0] sm:$0xff]  ;;  %v1679_v2 = vld [vmem:[%s2250_s0 + $0x10] sm:$0xff]  ;;  %s1614_s13 = smov 91   ;;  %s1615_s14 = smov 109   ;;  %522 = vmatprep.mubr.f32.mxu0 %v1620_v10  ;;  %593 = vmatprep.mubr.f32.mxu1 %v1620_v10  ;;  %vm439_vm3 = vcmask 1043456  }
   0x2   :  { %375 = vrot.lane.b32.xlu0 %v1671_v0, %s1612_s11  ;;  %v369_v3 = vcombine.high %v1671_v0, %v1671_v0  ;;  %371 = vrot.lane.b32.xlu1 %v360_v1, %s1612_s11  ;;  %v368_v4 = vcombine.high %v360_v1, %v360_v1  ;;  %42 = vst [vmem:[#allocation2 + $0xb0] sm:$0xf] %v360_v1  ;;  %44 = vst [vmem:[#allocation2 + $0xd8] sm:$0xf] %v1671_v0  ;;  %s1616_s15 = smov 108   ;;  %s1617_s16 = smov 126  }
   0x3   :  { %46 = vst [vmem:[#allocation2 + $0x50] sm:$0xf] %v1679_v2  ;;  %v1690_v5 = vcombine.high %v1679_v2, %v1679_v2  ;;  %v324_v6 = vcombine.low %v1671_v0, %v1671_v0  ;;  %v323_v7 = vcombine.low %v360_v1, %v360_v1  ;;  %s1618_s17 = smov 110   ;;  %s1619_s18 = smov 127   ;;  %v325_v8 = vcombine.low %v1679_v2, %v1679_v2  ;;  %v363_v9 = vld [vmem:[%s2250_s0 + $0x18] sm:$0xf] }
   0x4   :  { %43 = vst [vmem:[#allocation2] sm:$0xf] %v368_v4  ;;  %45 = vst [vmem:[#allocation2 + $0x18] sm:$0xf] %v369_v3  ;;  %v274_v11 = vld [vmem:[%s2250_s0 + $0x18] sm:$0xf] }
   0x5   :  { %47 = vst [vmem:[#allocation2 + $0x68] sm:$0xf] %v1690_v5  ;;  %v1604_v12 = vld [vmem:[%s2250_s0 + $0x18] ss:$0 sps:$4 sm:$0xff]   ;;  %vm207_vm4 = vcmask 891904   ;;  %vm252_vm5 = vcmask 883712  }
   0x6   :  { %373 = vrot.lane.b32.xlu0 %v368_v4, %s1612_s11  ;;  %284 = vrot.lane.b32.xlu1 %v368_v4, %s1613_s12  ;;  %v185_v13 = vld [vmem:[%s2250_s0 + $0x18] sm:$0xf]  ;;  %vm118_vm6 = vcmask 1031168   ;;  %vm163_vm7 = vcmask 900096   ;;  %vm74_vm8 = vcmask 1039360   ;;  %vm435_vm9 = vcmask 293888  }
   0x7   :  { %v1605_v14 = vld [vmem:[%s2250_s0 + $0x18] ss:$0 sps:$4 sm:$0xff]   ;;  %vm781_vm10 = vcmask 154624   ;;  %vm783_vm11 = vcmask 310424   ;;  %vm815_vm12 = vcmask 1047704   ;;  %vm1258_vm13 = vcmask 588800  }
   0x8   :  { %v96_v15 = vld [vmem:[%s2250_s0 + $0x18] sm:$0xf]  ;;  %782 = vst.msk [vmem:[#allocation4] sm:$0xff] %vm781_vm10, %v1620_v10 }
   0x9   :  { %v1606_v16 = vld [vmem:[%s2250_s0 + $0x18] ss:$0 sps:$4 sm:$0xff]   ;;  %784 = vst.msk [vmem:[#allocation4 + $0x30] sm:$0xff] %vm783_vm11, %v1620_v10 }
   0xa   :  { %286 = vrot.lane.b32.xlu0 %v1671_v0, %s1613_s12  ;;  %329 = vrot.lane.b32.xlu1 %v360_v1, %s1614_s13  ;;  %v1607_v17 = vld [vmem:[%s2250_s0 + $0x18] ss:$0 sps:$4 sm:$0xff]  }
   0xe   :  { %331 = vrot.lane.b32.xlu0 %v324_v6, %s1614_s13  ;;  %282 = vrot.lane.b32.xlu1 %v360_v1, %s1613_s12 }
  0x12   :  { %327 = vrot.lane.b32.xlu0 %v323_v7, %s1614_s13  ;;  %195 = vrot.lane.b32.xlu1 %v368_v4, %s1615_s14 }
  0x16   :  { %197 = vrot.lane.b32.xlu0 %v1671_v0, %s1615_s14  ;;  %240 = vrot.lane.b32.xlu1 %v360_v1, %s1616_s15 }
  0x1a   :  { %242 = vrot.lane.b32.xlu0 %v324_v6, %s1616_s15  ;;  %193 = vrot.lane.b32.xlu1 %v360_v1, %s1615_s14 }
  0x1e   :  { %238 = vrot.lane.b32.xlu0 %v323_v7, %s1616_s15  ;;  %106 = vrot.lane.b32.xlu1 %v368_v4, %s1617_s16 }
  0x22   :  { %108 = vrot.lane.b32.xlu0 %v1671_v0, %s1617_s16  ;;  %151 = vrot.lane.b32.xlu1 %v360_v1, %s1618_s17 }
  0x26   :  { %153 = vrot.lane.b32.xlu0 %v324_v6, %s1618_s17  ;;  %377 = vrot.lane.b32.xlu1 %v369_v3, %s1612_s11 }
  0x2a   :  { %379 = vrot.lane.b32.xlu0 %v1679_v2, %s1612_s11  ;;  %104 = vrot.lane.b32.xlu1 %v360_v1, %s1617_s16 }
  0x2e   :  { %149 = vrot.lane.b32.xlu0 %v323_v7, %s1618_s17  ;;  %62 = vrot.lane.b32.xlu1 %v360_v1, %s1619_s18 }
  0x32   :  { %64 = vrot.lane.b32.xlu0 %v324_v6, %s1619_s18  ;;  %288 = vrot.lane.b32.xlu1 %v369_v3, %s1613_s12 }
  0x36   :  { %290 = vrot.lane.b32.xlu0 %v1679_v2, %s1613_s12  ;;  %333 = vrot.lane.b32.xlu1 %v1671_v0, %s1614_s13 }
  0x3a   :  { %335 = vrot.lane.b32.xlu0 %v325_v8, %s1614_s13  ;;  %60 = vrot.lane.b32.xlu1 %v323_v7, %s1619_s18 }
  0x3e   :  { %199 = vrot.lane.b32.xlu0 %v369_v3, %s1615_s14  ;;  %201 = vrot.lane.b32.xlu1 %v1679_v2, %s1615_s14 }
  0x42   :  { %244 = vrot.lane.b32.xlu0 %v1671_v0, %s1616_s15  ;;  %246 = vrot.lane.b32.xlu1 %v325_v8, %s1616_s15 }
  0x46   :  { %381 = vrot.lane.b32.xlu0 %v1690_v5, %s1612_s11  ;;  %383 = vrot.lane.b32.xlu1 %v363_v9, %s1612_s11 }
  0x4a   :  { %110 = vrot.lane.b32.xlu0 %v369_v3, %s1617_s16  ;;  %112 = vrot.lane.b32.xlu1 %v1679_v2, %s1617_s16 }
  0x4e   :  { %155 = vrot.lane.b32.xlu0 %v1671_v0, %s1618_s17  ;;  %157 = vrot.lane.b32.xlu1 %v325_v8, %s1618_s17 }
  0x52   :  { %292 = vrot.lane.b32.xlu0 %v1690_v5, %s1613_s12  ;;  %294 = vrot.lane.b32.xlu1 %v274_v11, %s1613_s12 }
  0x56   :  { %337 = vrot.lane.b32.xlu0 %v1679_v2, %s1614_s13  ;;  %339 = vrot.lane.b32.xlu1 %v1604_v12, %s1614_s13 }
  0x5a   :  { %66 = vrot.lane.b32.xlu0 %v1671_v0, %s1619_s18  ;;  %68 = vrot.lane.b32.xlu1 %v325_v8, %s1619_s18 }
  0x5e   :  { %203 = vrot.lane.b32.xlu0 %v1690_v5, %s1615_s14  ;;  %205 = vrot.lane.b32.xlu1 %v185_v13, %s1615_s14 }
  0x62   :  { %248 = vrot.lane.b32.xlu0 %v1679_v2, %s1616_s15  ;;  %250 = vrot.lane.b32.xlu1 %v1605_v14, %s1616_s15 }
  0x66   :  { %114 = vrot.lane.b32.xlu0 %v1690_v5, %s1617_s16  ;;  %116 = vrot.lane.b32.xlu1 %v96_v15, %s1617_s16 }
  0x6a   :  { %159 = vrot.lane.b32.xlu0 %v1679_v2, %s1618_s17  ;;  %161 = vrot.lane.b32.xlu1 %v1606_v16, %s1618_s17 }
  0x6e   :  { %70 = vrot.lane.b32.xlu0 %v1679_v2, %s1619_s18  ;;  %72 = vrot.lane.b32.xlu1 %v1607_v17, %s1619_s18 }
  0x74   :  { %v376_v18 = vpop.permute.xlu0 %375  ;;  %v372_v19 = vpop.permute.xlu1 %371 }
  0x78   :  { %v374_v20 = vpop.permute.xlu0 %373  ;;  %v285_v21 = vpop.permute.xlu1 %284 }
  0x79   :  { %v386_v22 = vsel %vm385_vm0, %v372_v19, %v374_v20  ;;  %v387_v23 = vsel %vm385_vm0, %v374_v20, %v376_v18 }
  0x7a   :  { %398 = vst [vmem:[#allocation2 + $0x58] sm:$0xf] %v386_v22  ;;  %399 = vst [vmem:[#allocation2 + $0xd0] sm:$0xf] %v387_v23 }
  0x7c   :  { %v1798_v24 = vpop.permute.xlu0 %286  ;;  %v330_v25 = vpop.permute.xlu1 %329 }
  0x7d   :  { %v298_v26 = vsel %vm296_vm1, %v285_v21, %v1798_v24 }
  0x7e   :  { %310 = vst [vmem:[#allocation2 + $0x10] sm:$0xf] %v298_v26 }
  0x80   :  { %v1802_v27 = vpop.permute.xlu0 %331  ;;  %v283_v28 = vpop.permute.xlu1 %282 }
  0x81   :  { %v343_v29 = vsel %vm341_vm2, %v330_v25, %v1802_v27  ;;  %v297_v30 = vsel %vm296_vm1, %v283_v28, %v285_v21  ;;  %v430_v31 = vld [vmem:[#allocation2 + $0xd0] sm:$0xf]  ;;  %v429_v32 = vld [vmem:[#allocation2 + $0x58] sm:$0xf] }
  0x82   :  { %355 = vst [vmem:[#allocation2 + $0x10] sm:$0xf0] %v343_v29  ;;  %309 = vst [vmem:[#allocation2 + $0xc0] sm:$0xf] %v297_v30  ;;  %1573 = vmatprep.subr.msk.mxu0 %vm439_vm3, %v430_v31 }
  0x83   :  { %1574 = vmatpush1.msk.msra.mxu0 %vm439_vm3, %v429_v32 }
  0x84   :  { %v328_v33 = vpop.permute.xlu0 %327  ;;  %v196_v34 = vpop.permute.xlu1 %195 }
  0x85   :  { %v342_v35 = vsel %vm341_vm2, %v328_v33, %v330_v25 }
  0x86   :  { %354 = vst [vmem:[#allocation2 + $0xc0] sm:$0xf0] %v342_v35 }
  0x88   :  { %v1810_v36 = vpop.permute.xlu0 %197  ;;  %v241_v37 = vpop.permute.xlu1 %240 }
  0x89   :  { %v209_v38 = vsel %vm207_vm4, %v196_v34, %v1810_v36  ;;  %v424_v39 = vld [vmem:[#allocation2 + $0x10] sm:$0xff] }
  0x8a   :  { %221 = vst [vmem:[#allocation2 + $0xa8] sm:$0xf] %v209_v38  ;;  %482 = vmatprep.subr.mxu0 %v424_v39 }
  0x8c   :  { %v1814_v40 = vpop.permute.xlu0 %242  ;;  %v194_v41 = vpop.permute.xlu1 %193 }
  0x8d   :  { %v254_v42 = vsel %vm252_vm5, %v241_v37, %v1814_v40  ;;  %v208_v43 = vsel %vm207_vm4, %v194_v41, %v196_v34  ;;  %v423_v44 = vld [vmem:[#allocation2 + $0xc0] sm:$0xff] }
  0x8e   :  { %266 = vst [vmem:[#allocation2 + $0xa8] sm:$0xf0] %v254_v42  ;;  %220 = vst [vmem:[#allocation2 + $0x60] sm:$0xf] %v208_v43  ;;  %483 = vmatpush1.msra.mxu0 %v423_v44 }
  0x90   :  { %v239_v45 = vpop.permute.xlu0 %238  ;;  %v107_v46 = vpop.permute.xlu1 %106 }
  0x91   :  { %v253_v47 = vsel %vm252_vm5, %v239_v45, %v241_v37 }
  0x92   :  { %265 = vst [vmem:[#allocation2 + $0x60] sm:$0xf0] %v253_v47 }
  0x94   :  { %v1820_v48 = vpop.permute.xlu0 %108  ;;  %v152_v49 = vpop.permute.xlu1 %151 }
  0x95   :  { %v120_v50 = vsel %vm118_vm6, %v107_v46, %v1820_v48  ;;  %v418_v51 = vld [vmem:[#allocation2 + $0xa8] sm:$0xff] }
  0x96   :  { %132 = vst [vmem:[#allocation2 + $0x48] sm:$0xf] %v120_v50  ;;  %484 = vmatprep.subr.mxu0 %v418_v51 }
  0x98   :  { %v1824_v52 = vpop.permute.xlu0 %153  ;;  %v378_v53 = vpop.permute.xlu1 %377 }
  0x99   :  { %v165_v54 = vsel %vm163_vm7, %v152_v49, %v1824_v52  ;;  %v388_v55 = vsel %vm385_vm0, %v376_v18, %v378_v53  ;;  %v417_v56 = vld [vmem:[#allocation2 + $0x60] sm:$0xff] }
  0x9a   :  { %177 = vst [vmem:[#allocation2 + $0x48] sm:$0xf0] %v165_v54  ;;  %400 = vst [vmem:[#allocation2 + $0x98] sm:$0xf] %v388_v55  ;;  %485 = vmatpush1.msra.mxu0 %v417_v56 }
  0x9c   :  { %v1829_v57 = vpop.permute.xlu0 %379  ;;  %v105_v58 = vpop.permute.xlu1 %104 }
  0x9d   :  { %v389_v59 = vsel %vm385_vm0, %v378_v53, %v1829_v57  ;;  %v119_v60 = vsel %vm118_vm6, %v105_v58, %v107_v46 }
  0x9e   :  { %401 = vst [vmem:[#allocation2 + $0xc8] sm:$0xf] %v389_v59  ;;  %131 = vst [vmem:[#allocation2 + $0x30] sm:$0xf] %v119_v60 }
  0xa0   :  { %v150_v61 = vpop.permute.xlu0 %149  ;;  %v63_v62 = vpop.permute.xlu1 %62 }
  0xa1   :  { %v164_v63 = vsel %vm163_vm7, %v150_v61, %v152_v49  ;;  %v412_v0 = vld [vmem:[#allocation2 + $0x48] sm:$0xff]  ;;  %v431_v6 = vld [vmem:[#allocation2 + $0x98] sm:$0xf] }
  0xa2   :  { %176 = vst [vmem:[#allocation2 + $0x30] sm:$0xf0] %v164_v63  ;;  %486 = vmatprep.subr.mxu0 %v412_v0 }
  0xa4   :  { %v1835_v1 = vpop.permute.xlu0 %64  ;;  %v289_v2 = vpop.permute.xlu1 %288 }
  0xa5   :  { %v76_v3 = vsel %vm74_vm8, %v63_v62, %v1835_v1  ;;  %v299_v4 = vsel %vm296_vm1, %v1798_v24, %v289_v2  ;;  %v432_v5 = vld [vmem:[#allocation2 + $0xc8] sm:$0xf]  ;;  %v1865_v24 = vld [vmem:[%s2251_s2] sm:$0xff] }
  0xa6   :  { %88 = vst [vmem:[#allocation2] sm:$0xf0] %v76_v3  ;;  %311 = vst [vmem:[#allocation2 + $0x38] sm:$0xf] %v299_v4  ;;  %1576 = vmatprep.subr.msk.mxu1 %vm439_vm3, %v432_v5 }
  0xa7   :  { %1577 = vmatpush1.msk.msra.mxu1 %vm439_vm3, %v431_v6 }
  0xa8   :  { %v1843_v7 = vpop.permute.xlu0 %290  ;;  %v334_v8 = vpop.permute.xlu1 %333 }
  0xa9   :  { %v300_v9 = vsel %vm296_vm1, %v289_v2, %v1843_v7  ;;  %v344_v11 = vsel %vm341_vm2, %v1802_v27, %v334_v8  ;;  %v411_v12 = vld [vmem:[#allocation2 + $0x30] sm:$0xff] }
  0xaa   :  { %312 = vst [vmem:[#allocation2 + $0x28] sm:$0xf] %v300_v9  ;;  %356 = vst [vmem:[#allocation2 + $0x38] sm:$0xf0] %v344_v11  ;;  %487 = vmatpush1.msra.mxu0 %v411_v12 }
  0xac   :  { %v1849_v13 = vpop.permute.xlu0 %335  ;;  %v61_v14 = vpop.permute.xlu1 %60 }
  0xad   :  { %v345_v15 = vsel %vm341_vm2, %v334_v8, %v1849_v13  ;;  %v75_v16 = vsel %vm74_vm8, %v61_v14, %v63_v62  ;;  %v406_v17 = vld [vmem:[#allocation2] sm:$0xff] }
  0xae   :  { %357 = vst [vmem:[#allocation2 + $0x28] sm:$0xf0] %v345_v15  ;;  %87 = vst [vmem:[#allocation2 + $0xb0] sm:$0xf0] %v75_v16  ;;  %488 = vmatprep.subr.mxu0 %v406_v17 }
  0xb0   :  { %v200_v18 = vpop.permute.xlu0 %199  ;;  %v1854_v19 = vpop.permute.xlu1 %201 }
  0xb1   :  { %v210_v20 = vsel %vm207_vm4, %v1810_v36, %v200_v18  ;;  %v211_v21 = vsel %vm207_vm4, %v200_v18, %v1854_v19  ;;  %v425_v29 = vld [vmem:[#allocation2 + $0x38] sm:$0xff] }
  0xb2   :  { %222 = vst [vmem:[#allocation2 + $0x70] sm:$0xf] %v210_v20  ;;  %223 = vst [vmem:[#allocation2 + $0x40] sm:$0xf] %v211_v21 }
  0xb4   :  { %v245_v22 = vpop.permute.xlu0 %244  ;;  %v1860_v23 = vpop.permute.xlu1 %246 }
  0xb5   :  { %v255_v25 = vsel %vm252_vm5, %v1814_v40, %v245_v22  ;;  %v256_v26 = vsel %vm252_vm5, %v245_v22, %v1860_v23  ;;  %v405_v27 = vld [vmem:[#allocation2 + $0xb0] sm:$0xff]  ;;  %v426_v28 = vld [vmem:[#allocation2 + $0x28] sm:$0xff] }
  0xb6   :  { %267 = vst [vmem:[#allocation2 + $0x70] sm:$0xf0] %v255_v25  ;;  %268 = vst [vmem:[#allocation2 + $0x40] sm:$0xf0] %v256_v26  ;;  %489 = vmatpush1.msra.mxu0 %v405_v27  ;;  %553 = vmatprep.subr.mxu1 %v426_v28  ;;  %v674_v28 = vlaneseq }
  0xb7   :  { %554 = vmatpush1.msra.mxu1 %v425_v29  ;;  %1575 = vmatmul.mubr.msk.f32.vlgmr.msra.gmra.mxu0 %vm435_vm9, %v1865_v24 }
  0xb8   :  { %v382_v30 = vpop.permute.xlu0 %381  ;;  %v384_v31 = vpop.permute.xlu1 %383  ;;  %664 = vmatprep.mubr.f32.mxu0 %v1620_v10  ;;  %v675_v29 = vshrl.u32 %v674_v28, 7 }
  0xb9   :  { %v390_v32 = vsel %vm385_vm0, %v1829_v57, %v382_v30  ;;  %v391_v33 = vsel %vm385_vm0, %v382_v30, %v384_v31 }
  0xba   :  { %402 = vst [vmem:[#allocation2 + $0xe0] sm:$0xf] %v390_v32  ;;  %403 = vst [vmem:[#allocation2 + $0x20] sm:$0xf] %v391_v33  ;;  %v676_v30 = vsub.s32 0, %v675_v29  ;;  %v680_v31 = vsub.s32 1, %v675_v29 }
  0xbb   :  { %v29_v32 = vld [vmem:[%s2252_s1] sm:$0x3f] }
  0xbc   :  { %v111_v34 = vpop.permute.xlu0 %110  ;;  %v1877_v35 = vpop.permute.xlu1 %112 }
  0xbd   :  { %v121_v36 = vsel %vm118_vm6, %v1820_v48, %v111_v34  ;;  %v122_v37 = vsel %vm118_vm6, %v111_v34, %v1877_v35  ;;  %v420_v38 = vld [vmem:[#allocation2 + $0x40] sm:$0xff]  ;;  %v419_v39 = vld [vmem:[#allocation2 + $0x70] sm:$0xff]  ;;  %v1919_v34 = vrot.slane %v29_v32, %v676_v30 }
  0xbe   :  { %133 = vst [vmem:[#allocation2 + $0x80] sm:$0xf] %v121_v36  ;;  %134 = vst [vmem:[#allocation2 + $0x88] sm:$0xf] %v122_v37  ;;  %555 = vmatprep.subr.mxu1 %v420_v38  ;;  %v684_v36 = vsub.s32 2, %v675_v29 }
  0xbf   :  { %556 = vmatpush1.msra.mxu1 %v419_v39 }
  0xc0   :  { %v156_v40 = vpop.permute.xlu0 %155  ;;  %v158_v41 = vpop.permute.xlu1 %157  ;;  %v1925_v39 = vrot.slane %v29_v32, %v684_v36 }
  0xc1   :  { %v166_v42 = vsel %vm163_vm7, %v1824_v52, %v156_v40  ;;  %v167_v43 = vsel %vm163_vm7, %v156_v40, %v158_v41  ;;  %v434_v44 = vld [vmem:[#allocation2 + $0x20] sm:$0xf]  ;;  %v688_v40 = vsub.s32 3, %v675_v29 }
  0xc2   :  { %v433_v45 = vld [vmem:[#allocation2 + $0xe0] sm:$0xf]  ;;  %178 = vst [vmem:[#allocation2 + $0x80] sm:$0xf0] %v166_v42  ;;  %179 = vst [vmem:[#allocation2 + $0x88] sm:$0xf0] %v167_v43  ;;  %1579 = vmatprep.subr.msk.mxu0 %vm439_vm3, %v434_v44 }
  0xc3   :  { %1580 = vmatpush1.msk.msra.mxu0 %vm439_vm3, %v433_v45  ;;  %v1928_v44 = vrot.slane %v29_v32, %v688_v40  ;;  %v692_v45 = vsub.s32 4, %v675_v29 }
  0xc4   :  { %v293_v46 = vpop.permute.xlu0 %292  ;;  %v295_v47 = vpop.permute.xlu1 %294 }
  0xc5   :  { %v301_v48 = vsel %vm296_vm1, %v1843_v7, %v293_v46  ;;  %v302_v49 = vsel %vm296_vm1, %v293_v46, %v295_v47  ;;  %v696_v47 = vsub.s32 5, %v675_v29 }
  0xc6   :  { %313 = vst [vmem:[#allocation2 + $0x90] sm:$0xf] %v301_v48  ;;  %314 = vst [vmem:[#allocation2 + $0xa0] sm:$0xf] %v302_v49 }
  0xc8   :  { %v338_v50 = vpop.permute.xlu0 %337  ;;  %v340_v51 = vpop.permute.xlu1 %339 }
  0xc9   :  { %v346_v52 = vsel %vm341_vm2, %v1849_v13, %v338_v50  ;;  %v347_v53 = vsel %vm341_vm2, %v338_v50, %v340_v51  ;;  %v414_v54 = vld [vmem:[#allocation2 + $0x88] sm:$0xff]  ;;  %v413_v55 = vld [vmem:[#allocation2 + $0x80] sm:$0xff]  ;;  %v1931_v50 = vrot.slane %v29_v32, %v692_v45  ;;  %v1933_v51 = vrot.slane %v29_v32, %v696_v47 }
  0xca   :  { %358 = vst [vmem:[#allocation2 + $0x90] sm:$0xf0] %v346_v52  ;;  %359 = vst [vmem:[#allocation2 + $0xa0] sm:$0xf0] %v347_v53  ;;  %557 = vmatprep.subr.mxu1 %v414_v54 }
  0xcb   :  { %558 = vmatpush1.msra.mxu1 %v413_v55 }
  0xcc   :  { %v67_v56 = vpop.permute.xlu0 %66  ;;  %v69_v57 = vpop.permute.xlu1 %68 }
  0xcd   :  { %v77_v58 = vsel %vm74_vm8, %v1835_v1, %v67_v56  ;;  %v78_v59 = vsel %vm74_vm8, %v67_v56, %v69_v57 }
  0xce   :  { %89 = vst [vmem:[#allocation2 + $0xd8] sm:$0xf0] %v77_v58  ;;  %90 = vst [vmem:[#allocation2 + $0x18] sm:$0xf0] %v78_v59 }
  0xd0   :  { %v204_v60 = vpop.permute.xlu0 %203  ;;  %v206_v61 = vpop.permute.xlu1 %205 }
  0xd1   :  { %v212_v62 = vsel %vm207_vm4, %v1854_v19, %v204_v60  ;;  %v213_v63 = vsel %vm207_vm4, %v204_v60, %v206_v61  ;;  %v428_v0 = vld [vmem:[#allocation2 + $0xa0] sm:$0xff]  ;;  %v427_v2 = vld [vmem:[#allocation2 + $0x90] sm:$0xff] }
  0xd2   :  { %224 = vst [vmem:[#allocation2 + $0x8] sm:$0xf] %v212_v62  ;;  %225 = vst [vmem:[#allocation2 + $0x78] sm:$0xf] %v213_v63  ;;  %624 = vmatprep.subr.mxu0 %v428_v0 }
  0xd3   :  { %625 = vmatpush1.msra.mxu0 %v427_v2 }
  0xd4   :  { %v249_v3 = vpop.permute.xlu0 %248  ;;  %v251_v4 = vpop.permute.xlu1 %250 }
  0xd5   :  { %v257_v1 = vsel %vm252_vm5, %v1860_v23, %v249_v3  ;;  %v258_v5 = vsel %vm252_vm5, %v249_v3, %v251_v4  ;;  %v408_v6 = vld [vmem:[#allocation2 + $0x18] sm:$0xff] }
  0xd6   :  { %v407_v7 = vld [vmem:[#allocation2 + $0xd8] sm:$0xff]  ;;  %269 = vst [vmem:[#allocation2 + $0x8] sm:$0xf0] %v257_v1  ;;  %270 = vst [vmem:[#allocation2 + $0x78] sm:$0xf0] %v258_v5  ;;  %559 = vmatprep.subr.mxu1 %v408_v6 }
  0xd7   :  { %560 = vmatpush1.msra.mxu1 %v407_v7 }
  0xd8   :  { %v115_v8 = vpop.permute.xlu0 %114  ;;  %v117_v9 = vpop.permute.xlu1 %116  ;;  %1578 = vmatmul.mubr.msk.f32.vlgmr.msra.gmra.mxu1 %vm435_vm9, %v1865_v24 }
  0xd9   :  { %v123_v11 = vsel %vm118_vm6, %v1877_v35, %v115_v8  ;;  %v124_v12 = vsel %vm118_vm6, %v115_v8, %v117_v9  ;;  %1326 = vmatprep.mubr.f32.mxu1 %v1620_v10  ;;  %v1921_v35 = vrot.slane %v29_v32, %v680_v31 }
  0xda   :  { %135 = vst [vmem:[#allocation2 + $0xe8] sm:$0xf] %v123_v11  ;;  %136 = vst [vmem:[#allocation2 + $0xb8] sm:$0xf] %v124_v12 }
  0xdc   :  { %v160_v13 = vpop.permute.xlu0 %159  ;;  %v162_v14 = vpop.permute.xlu1 %161 }
  0xdd   :  { %v168_v15 = vsel %vm163_vm7, %v158_v41, %v160_v13  ;;  %v169_v16 = vsel %vm163_vm7, %v160_v13, %v162_v14  ;;  %v422_v17 = vld [vmem:[#allocation2 + $0x78] sm:$0xff]  ;;  %v421_v18 = vld [vmem:[#allocation2 + $0x8] sm:$0xff] }
  0xde   :  { %180 = vst [vmem:[#allocation2 + $0xe8] sm:$0xf0] %v168_v15  ;;  %181 = vst [vmem:[#allocation2 + $0xb8] sm:$0xf0] %v169_v16  ;;  %626 = vmatprep.subr.mxu0 %v422_v17 }
  0xdf   :  { %627 = vmatpush1.msra.mxu0 %v421_v18 }
  0xe0   :  { %v71_v19 = vpop.permute.xlu0 %70  ;;  %v73_v20 = vpop.permute.xlu1 %72 }
  0xe1   :  { %v79_v21 = vsel %vm74_vm8, %v69_v57, %v71_v19  ;;  %v80_v22 = vsel %vm74_vm8, %v71_v19, %v73_v20 }
  0xe2   :  { %91 = vst [vmem:[#allocation2 + $0x50] sm:$0xf0] %v79_v21  ;;  %92 = vst [vmem:[#allocation2 + $0x68] sm:$0xf0] %v80_v22  ;;  %v1621_v21 = vmov 0   ;;  %v672_v22 = vld [vmem:[%s2253_s5] sm:$0xff] }
  0xe3   :  { %1596 = vset.pattern.permute.xlu0 %v1621_v21  ;;  %1597 = vset.pattern.permute.xlu1 %v1621_v21 }
  0xe5   :  { %v416_v23 = vld [vmem:[#allocation2 + $0xb8] sm:$0xff]  ;;  %v415_v25 = vld [vmem:[#allocation2 + $0xe8] sm:$0xff] }
  0xe6   :  { %628 = vmatprep.subr.mxu0 %v416_v23 }
  0xe7   :  { %629 = vmatpush1.msra.mxu0 %v415_v25 }
  0xe9   :  { %v410_v26 = vld [vmem:[#allocation2 + $0x68] sm:$0xff]  ;;  %v409_v27 = vld [vmem:[#allocation2 + $0x50] sm:$0xff] }
  0xea   :  { %630 = vmatprep.subr.mxu0 %v410_v26 }
  0xeb   :  { %631 = vmatpush1.msra.mxu0 %v409_v27  ;;  %v671_v27 = vld [vmem:[%s2254_s4] sm:$0xff]  ;;  %s1622_s4 = smov 19  }
  0xec   :  { %1581 = vmatmul.mubr.msk.f32.vlgmr.msra.gmra.mxu0 %vm435_vm9, %v1865_v24 }
  0xed   :  { %1397 = vmatprep.mubr.f32.mxu0 %v1620_v10 }
 0x177   :  { %v524_v33 = vpop.f32.mrf.mxu0 }
 0x178   :  { %v704_v38 = vmul.f32 %v1919_v34, %v524_v33 }
 0x179   :  { %v526_v37 = vpop.f32.mrf.mxu0 }
 0x17a   :  { %v705_v24 = vmul.f32 %v1921_v35, %v526_v37 }
 0x17c   :  { %v710_v42 = vadd.f32 %v705_v24, %v704_v38 }
 0x198   :  { %v595_v41 = vpop.f32.mrf.mxu1 }
 0x199   :  { %v706_v43 = vmul.f32 %v1925_v39, %v595_v41 }
 0x19a   :  { %v597_v46 = vpop.f32.mrf.mxu1 }
 0x19b   :  { %v711_v48 = vadd.f32 %v710_v42, %v706_v43  ;;  %v707_v49 = vmul.f32 %v1928_v44, %v597_v46 }
 0x19d   :  { %v712_v53 = vadd.f32 %v711_v48, %v707_v49 }
 0x1ac   :  { %v666_v52 = vpop.f32.mrf.mxu0 }
 0x1ad   :  { %v708_v54 = vmul.f32 %v1931_v50, %v666_v52 }
 0x1ae   :  { %v668_v55 = vpop.f32.mrf.mxu0 }
 0x1af   :  { %v709_v56 = vmul.f32 %v1933_v51, %v668_v55  ;;  %v713_v57 = vadd.f32 %v712_v53, %v708_v54 }
 0x1b1   :  { %v714_v58 = vadd.f32 %v713_v57, %v709_v56 }
 0x1b3   :  { %715 = vadd.xlane.f32.xlu0 %v714_v58 }
 0x23c   :  { %v716_v59 = vpop.xlane.xlu0 %715 }
 0x23d   :  { %v717_v60 = vmul.f32 0.001953125, %v716_v59 }
 0x23f   :  { %v718_v61 = vsub.f32 %v524_v33, %v717_v60  ;;  %v719_v62 = vsub.f32 %v526_v37, %v717_v60  ;;  %v720_v63 = vsub.f32 %v595_v41, %v717_v60  ;;  %v721_v0 = vsub.f32 %v597_v46, %v717_v60 }
 0x240   :  { %v722_v2 = vsub.f32 %v666_v52, %v717_v60  ;;  %v723_v5 = vsub.f32 %v668_v55, %v717_v60 }
 0x241   :  { %v724_v3 = vmul.f32 %v718_v61, %v1919_v34  ;;  %v725_v4 = vmul.f32 %v719_v62, %v1921_v35  ;;  %v726_v1 = vmul.f32 %v720_v63, %v1925_v39  ;;  %v727_v6 = vmul.f32 %v721_v0, %v1928_v44 }
 0x242   :  { %v728_v9 = vmul.f32 %v722_v2, %v1931_v50  ;;  %v729_v13 = vmul.f32 %v723_v5, %v1933_v51 }
 0x243   :  { %v730_v7 = vmul.f32 %v724_v3, %v724_v3  ;;  %v731_v8 = vmul.f32 %v725_v4, %v725_v4  ;;  %v732_v11 = vmul.f32 %v726_v1, %v726_v1  ;;  %v733_v14 = vmul.f32 %v727_v6, %v727_v6 }
 0x244   :  { %v734_v16 = vmul.f32 %v728_v9, %v728_v9  ;;  %v735_v18 = vmul.f32 %v729_v13, %v729_v13 }
 0x245   :  { %v736_v12 = vadd.f32 %v731_v8, %v730_v7 }
 0x247   :  { %v737_v15 = vadd.f32 %v736_v12, %v732_v11 }
 0x249   :  { %v738_v17 = vadd.f32 %v737_v15, %v733_v14 }
 0x24b   :  { %v739_v19 = vadd.f32 %v738_v17, %v734_v16 }
 0x24d   :  { %v740_v20 = vadd.f32 %v739_v19, %v735_v18 }
 0x24f   :  { %741 = vadd.xlane.f32.xlu1 %v740_v20 }
 0x260   :  { %760 = vperm.xlu1 %1597, %v672_v22  }
 0x2d8   :  { %v742_v23 = vpop.xlane.xlu1 %741 }
 0x2d9   :  { %v743_v25 = vmul.f32 0.001953125, %v742_v23 }
 0x2db   :  { %v744_v26 = vadd.f32 1e-05, %v743_v25 }
 0x2dc   :  { %v761_v31 = vpop.permute.xlu1 %760 }
 0x2dd   :  { %1608 = vrsqrt.f32 %v744_v26 }
 0x2ea   :  { %v1609_v28 = vpop.eup %1608 }
 0x2eb   :  { %v746_v29 = vmul.f32 %v1609_v28, %v671_v27 }
 0x2ed   :  { %749 = vperm.xlu0 %1596, %v746_v29  }
 0x368   :  { %v750_v30 = vpop.permute.xlu0 %749 }
 0x369   :  { %v752_v32 = vmul.f32 %v750_v30, %v724_v3  ;;  %v753_v33 = vmul.f32 %v750_v30, %v725_v4  ;;  %v754_v38 = vmul.f32 %v750_v30, %v726_v1  ;;  %v755_v43 = vmul.f32 %v750_v30, %v727_v6 }
 0x36a   :  { %v756_v48 = vmul.f32 %v750_v30, %v728_v9  ;;  %v757_v54 = vmul.f32 %v750_v30, %v729_v13 }
 0x36b   :  { %v763_v36 = vadd.f32 %v761_v31, %v752_v32  ;;  %v764_v37 = vadd.f32 %v761_v31, %v753_v33  ;;  %v765_v42 = vadd.f32 %v761_v31, %v754_v38  ;;  %v766_v47 = vadd.f32 %v761_v31, %v755_v43 }
 0x36c   :  { %v767_v53 = vadd.f32 %v761_v31, %v756_v48  ;;  %v768_v57 = vadd.f32 %v761_v31, %v757_v54 }
 0x36d   :  { %v769_v24 = vmax.f32 %v763_v36, 0.0  ;;  %v770_v41 = vmax.f32 %v764_v37, 0.0  ;;  %v771_v46 = vmax.f32 %v765_v42, 0.0  ;;  %v772_v52 = vmax.f32 %v766_v47, 0.0 }
 0x36e   :  { %v773_v56 = vmax.f32 %v767_v53, 0.0  ;;  %v774_v59 = vmax.f32 %v768_v57, 0.0 }
 0x36f   :  { %v775_v40 = vmul.f32 %v769_v24, %v1919_v34  ;;  %v776_v45 = vmul.f32 %v770_v41, %v1921_v35  ;;  %v777_v49 = vmul.f32 %v771_v46, %v1925_v39  ;;  %v778_v55 = vmul.f32 %v772_v52, %v1928_v44 }
 0x370   :  { %v779_v58 = vmul.f32 %v773_v56, %v1931_v50  ;;  %v780_v60 = vmul.f32 %v774_v59, %v1933_v51 }
 0x371   :  { %791 = vrot.lane.b32.xlu1 %v775_v40, %s1622_s4 }
 0x375   :  { %793 = vrot.lane.b32.xlu1 %v776_v45, %s1622_s4 }
 0x379   :  { %795 = vrot.lane.b32.xlu1 %v777_v49, %s1622_s4 }
 0x37d   :  { %797 = vrot.lane.b32.xlu1 %v778_v55, %s1622_s4 }
 0x381   :  { %799 = vrot.lane.b32.xlu1 %v779_v58, %s1622_s4 }
 0x385   :  { %801 = vrot.lane.b32.xlu1 %v780_v60, %s1622_s4 }
 0x3e3   :  { %v792_v61 = vpop.permute.xlu1 %791 }
 0x3e4   :  { %816 = vst.msk [vmem:[#allocation4] sm:$0xff] %vm815_vm12, %v792_v61 }
 0x3e7   :  { %v794_v62 = vpop.permute.xlu1 %793 }
 0x3e8   :  { %v1959_v63 = vsel %vm781_vm10, %v792_v61, %v794_v62 }
 0x3eb   :  { %v796_v0 = vpop.permute.xlu1 %795  ;;  %v1961_v2 = vld [vmem:[#allocation4] sm:$0xff] }
 0x3ec   :  { %v1964_v3 = vsel %vm781_vm10, %v794_v62, %v796_v0  ;;  %1171 = vrot.lane.b32.xlu0 %v1961_v2, %s1612_s11  ;;  %1125 = vrot.lane.b32.xlu1 %v1961_v2, %s1614_s13 }
 0x3ef   :  { %v798_v4 = vpop.permute.xlu1 %797 }
 0x3f0   :  { %v1971_v1 = vsel %vm781_vm10, %v796_v0, %v798_v4  ;;  %1079 = vrot.lane.b32.xlu0 %v1961_v2, %s1613_s12  ;;  %1033 = vrot.lane.b32.xlu1 %v1961_v2, %s1616_s15 }
 0x3f3   :  { %v800_v5 = vpop.permute.xlu1 %799 }
 0x3f4   :  { %v1978_v6 = vsel %vm781_vm10, %v798_v4, %v800_v5  ;;  %987 = vrot.lane.b32.xlu0 %v1961_v2, %s1615_s14  ;;  %941 = vrot.lane.b32.xlu1 %v1961_v2, %s1618_s17 }
 0x3f7   :  { %v802_v7 = vpop.permute.xlu1 %801 }
 0x3f8   :  { %v1985_v8 = vsel %vm781_vm10, %v800_v5, %v802_v7  ;;  %822 = vst.msk [vmem:[#allocation4 + $0x30] sm:$0xff] %vm781_vm10, %v802_v7  ;;  %895 = vrot.lane.b32.xlu0 %v1961_v2, %s1617_s16  ;;  %849 = vrot.lane.b32.xlu1 %v1961_v2, %s1619_s18 }
 0x3fc   :  { %1173 = vrot.lane.b32.xlu0 %v1959_v63, %s1612_s11 }
 0x3ff   :  { %v1163_v9 = vld [vmem:[#allocation4 + $0x30] sm:$0xff] }
 0x400   :  { %1129 = vrot.lane.b32.xlu0 %v1964_v3, %s1614_s13  ;;  %1183 = vrot.lane.b32.xlu1 %v1163_v9, %s1612_s11 }
 0x404   :  { %1081 = vrot.lane.b32.xlu0 %v1959_v63, %s1613_s12  ;;  %1137 = vrot.lane.b32.xlu1 %v1163_v9, %s1614_s13 }
 0x408   :  { %1037 = vrot.lane.b32.xlu0 %v1964_v3, %s1616_s15  ;;  %1091 = vrot.lane.b32.xlu1 %v1163_v9, %s1613_s12 }
 0x40c   :  { %989 = vrot.lane.b32.xlu0 %v1959_v63, %s1615_s14  ;;  %1045 = vrot.lane.b32.xlu1 %v1163_v9, %s1616_s15 }
 0x410   :  { %945 = vrot.lane.b32.xlu0 %v1964_v3, %s1618_s17  ;;  %999 = vrot.lane.b32.xlu1 %v1163_v9, %s1615_s14 }
 0x414   :  { %897 = vrot.lane.b32.xlu0 %v1959_v63, %s1617_s16  ;;  %953 = vrot.lane.b32.xlu1 %v1163_v9, %s1618_s17 }
 0x418   :  { %853 = vrot.lane.b32.xlu0 %v1964_v3, %s1619_s18  ;;  %907 = vrot.lane.b32.xlu1 %v1163_v9, %s1617_s16 }
 0x41c   :  { %1179 = vrot.lane.b32.xlu0 %v1978_v6, %s1612_s11  ;;  %1175 = vrot.lane.b32.xlu1 %v1964_v3, %s1612_s11 }
 0x420   :  { %1131 = vrot.lane.b32.xlu0 %v1971_v1, %s1614_s13  ;;  %1127 = vrot.lane.b32.xlu1 %v1959_v63, %s1614_s13 }
 0x424   :  { %1085 = vrot.lane.b32.xlu0 %v1971_v1, %s1613_s12  ;;  %1083 = vrot.lane.b32.xlu1 %v1964_v3, %s1613_s12 }
 0x428   :  { %1035 = vrot.lane.b32.xlu1 %v1959_v63, %s1616_s15  ;;  %1181 = vrot.lane.b32.xlu0 %v1985_v8, %s1612_s11 }
 0x42c   :  { %991 = vrot.lane.b32.xlu1 %v1964_v3, %s1615_s14  ;;  %1039 = vrot.lane.b32.xlu0 %v1971_v1, %s1616_s15 }
 0x430   :  { %943 = vrot.lane.b32.xlu1 %v1959_v63, %s1618_s17  ;;  %1135 = vrot.lane.b32.xlu0 %v1985_v8, %s1614_s13 }
 0x434   :  { %899 = vrot.lane.b32.xlu1 %v1964_v3, %s1617_s16  ;;  %993 = vrot.lane.b32.xlu0 %v1971_v1, %s1615_s14 }
 0x438   :  { %851 = vrot.lane.b32.xlu1 %v1959_v63, %s1619_s18  ;;  %1089 = vrot.lane.b32.xlu0 %v1985_v8, %s1613_s12 }
 0x43c   :  { %1177 = vrot.lane.b32.xlu1 %v1971_v1, %s1612_s11  ;;  %947 = vrot.lane.b32.xlu0 %v1971_v1, %s1618_s17 }
 0x440   :  { %1133 = vrot.lane.b32.xlu1 %v1978_v6, %s1614_s13  ;;  %1043 = vrot.lane.b32.xlu0 %v1985_v8, %s1616_s15 }
 0x444   :  { %1087 = vrot.lane.b32.xlu1 %v1978_v6, %s1613_s12  ;;  %901 = vrot.lane.b32.xlu0 %v1971_v1, %s1617_s16 }
 0x448   :  { %1041 = vrot.lane.b32.xlu1 %v1978_v6, %s1616_s15  ;;  %997 = vrot.lane.b32.xlu0 %v1985_v8, %s1615_s14 }
 0x44c   :  { %995 = vrot.lane.b32.xlu1 %v1978_v6, %s1615_s14  ;;  %855 = vrot.lane.b32.xlu0 %v1971_v1, %s1619_s18 }
 0x450   :  { %949 = vrot.lane.b32.xlu1 %v1978_v6, %s1618_s17  ;;  %951 = vrot.lane.b32.xlu0 %v1985_v8, %s1618_s17 }
 0x454   :  { %903 = vrot.lane.b32.xlu1 %v1978_v6, %s1617_s16  ;;  %905 = vrot.lane.b32.xlu0 %v1985_v8, %s1617_s16 }
 0x458   :  { %857 = vrot.lane.b32.xlu1 %v1978_v6, %s1619_s18  ;;  %859 = vrot.lane.b32.xlu0 %v1985_v8, %s1619_s18 }
 0x45c   :  { %861 = vrot.lane.b32.xlu1 %v1163_v9, %s1619_s18 }
 0x45e   :  { %v1172_v11 = vpop.permute.xlu0 %1171  ;;  %v1126_v12 = vpop.permute.xlu1 %1125 }
 0x462   :  { %v1080_v13 = vpop.permute.xlu0 %1079  ;;  %v1034_v14 = vpop.permute.xlu1 %1033 }
 0x466   :  { %v988_v15 = vpop.permute.xlu0 %987  ;;  %v942_v16 = vpop.permute.xlu1 %941 }
 0x46a   :  { %v896_v17 = vpop.permute.xlu0 %895  ;;  %v850_v18 = vpop.permute.xlu1 %849 }
 0x46e   :  { %v1174_v19 = vpop.permute.xlu0 %1173 }
 0x46f   :  { %v1185_v40 = vsel %vm385_vm0, %v1172_v11, %v1174_v19 }
 0x472   :  { %v2080_v20 = vpop.permute.xlu0 %1129  ;;  %v2082_v21 = vpop.permute.xlu1 %1183 }
 0x476   :  { %v1082_v22 = vpop.permute.xlu0 %1081  ;;  %v2084_v23 = vpop.permute.xlu1 %1137 }
 0x477   :  { %v1093_v49 = vsel %vm296_vm1, %v1080_v13, %v1082_v22 }
 0x47a   :  { %v2086_v25 = vpop.permute.xlu0 %1037  ;;  %v2088_v26 = vpop.permute.xlu1 %1091 }
 0x47e   :  { %v990_v27 = vpop.permute.xlu0 %989  ;;  %v2090_v28 = vpop.permute.xlu1 %1045 }
 0x47f   :  { %v1001_v59 = vsel %vm207_vm4, %v988_v15, %v990_v27 }
 0x482   :  { %v2092_v29 = vpop.permute.xlu0 %945  ;;  %v2094_v30 = vpop.permute.xlu1 %999 }
 0x486   :  { %v898_v31 = vpop.permute.xlu0 %897  ;;  %v2096_v32 = vpop.permute.xlu1 %953 }
 0x487   :  { %v909_v9 = vsel %vm118_vm6, %v896_v17, %v898_v31 }
 0x48a   :  { %v2098_v33 = vpop.permute.xlu0 %853  ;;  %v2100_v36 = vpop.permute.xlu1 %907 }
 0x48e   :  { %v1180_v37 = vpop.permute.xlu0 %1179  ;;  %v1176_v38 = vpop.permute.xlu1 %1175 }
 0x48f   :  { %v1186_v24 = vsel %vm385_vm0, %v1174_v19, %v1176_v38  ;;  %v2143_v19 = vld [vmem:[%s2255_s3] sm:$0xf] }
 0x490   :  { %1276 = vmatprep.subr.mxu1 %v1186_v24 }
 0x491   :  { %1277 = vmatpush1.msra.mxu1 %v1185_v40 }
 0x492   :  { %v2104_v41 = vpop.permute.xlu0 %1131  ;;  %v1128_v42 = vpop.permute.xlu1 %1127 }
 0x493   :  { %v1139_v43 = vsel %vm341_vm2, %v1126_v12, %v1128_v42  ;;  %v1140_v45 = vsel %vm341_vm2, %v1128_v42, %v2080_v20 }
 0x494   :  { %1278 = vmatprep.subr.mxu1 %v1140_v45 }
 0x495   :  { %1279 = vmatpush1.msra.mxu1 %v1139_v43 }
 0x496   :  { %v2109_v46 = vpop.permute.xlu0 %1085  ;;  %v2111_v47 = vpop.permute.xlu1 %1083 }
 0x497   :  { %v1094_v48 = vsel %vm296_vm1, %v1082_v22, %v2111_v47  ;;  %v1095_v43 = vsel %vm296_vm1, %v2111_v47, %v2109_v46 }
 0x498   :  { %1280 = vmatprep.subr.mxu1 %v1094_v48 }
 0x499   :  { %1281 = vmatpush1.msra.mxu1 %v1093_v49 }
 0x49a   :  { %v1182_v52 = vpop.permute.xlu0 %1181  ;;  %v1036_v53 = vpop.permute.xlu1 %1035 }
 0x49b   :  { %v1047_v54 = vsel %vm252_vm5, %v1034_v14, %v1036_v53  ;;  %v1048_v55 = vsel %vm252_vm5, %v1036_v53, %v2086_v25  ;;  %v1190_v22 = vsel %vm385_vm0, %v1182_v52, %v2082_v21 }
 0x49c   :  { %1282 = vmatprep.subr.mxu1 %v1048_v55 }
 0x49d   :  { %1283 = vmatpush1.msra.mxu1 %v1047_v54 }
 0x49e   :  { %v2119_v56 = vpop.permute.xlu0 %1039  ;;  %v2121_v57 = vpop.permute.xlu1 %991 }
 0x49f   :  { %v1002_v58 = vsel %vm207_vm4, %v990_v27, %v2121_v57 }
 0x4a0   :  { %1284 = vmatprep.subr.mxu1 %v1002_v58 }
 0x4a1   :  { %1285 = vmatpush1.msra.mxu1 %v1001_v59 }
 0x4a2   :  { %v1136_v60 = vpop.permute.xlu0 %1135  ;;  %v944_v61 = vpop.permute.xlu1 %943 }
 0x4a3   :  { %v955_v62 = vsel %vm163_vm7, %v942_v16, %v944_v61  ;;  %v956_v0 = vsel %vm163_vm7, %v944_v61, %v2092_v29 }
 0x4a4   :  { %1286 = vmatprep.subr.mxu1 %v956_v0 }
 0x4a5   :  { %1287 = vmatpush1.msra.mxu1 %v955_v62 }
 0x4a6   :  { %v2129_v4 = vpop.permute.xlu0 %993  ;;  %v2131_v5 = vpop.permute.xlu1 %899 }
 0x4a7   :  { %v910_v7 = vsel %vm118_vm6, %v898_v31, %v2131_v5  ;;  %v1144_v31 = vsel %vm341_vm2, %v1136_v60, %v2084_v23  ;;  %v1003_v54 = vsel %vm207_vm4, %v2121_v57, %v2129_v4 }
 0x4a8   :  { %1288 = vmatprep.subr.mxu1 %v910_v7 }
 0x4a9   :  { %1289 = vmatpush1.msra.mxu1 %v909_v9 }
 0x4aa   :  { %v1090_v11 = vpop.permute.xlu0 %1089  ;;  %v852_v12 = vpop.permute.xlu1 %851 }
 0x4ab   :  { %v863_v13 = vsel %vm74_vm8, %v850_v18, %v852_v12  ;;  %v864_v14 = vsel %vm74_vm8, %v852_v12, %v2098_v33  ;;  %v1098_v24 = vsel %vm296_vm1, %v1090_v11, %v2088_v26 }
 0x4ac   :  { %1290 = vmatprep.subr.mxu1 %v864_v14 }
 0x4ad   :  { %1291 = vmatpush1.msra.mxu1 %v863_v13 }
 0x4ae   :  { %v948_v15 = vpop.permute.xlu0 %947  ;;  %1292 = vmatprep.subr.mxu1 %v1959_v63  ;;  %v1178_v16 = vpop.permute.xlu1 %1177  ;;  %v1189_v63 = vsel %vm385_vm0, %v1180_v37, %v1182_v52 }
 0x4af   :  { %v1187_v17 = vsel %vm385_vm0, %v1176_v38, %v1178_v16  ;;  %1293 = vmatpush1.msra.mxu1 %v1961_v2  ;;  %v1188_v18 = vsel %vm385_vm0, %v1178_v16, %v1180_v37  ;;  %v1141_v37 = vsel %vm341_vm2, %v2080_v20, %v2104_v41  ;;  %v957_v59 = vsel %vm163_vm7, %v2092_v29, %v948_v15 }
 0x4b0   :  { %1347 = vmatprep.subr.mxu0 %v1188_v18  ;;  %1418 = vmatprep.subr.mxu1 %v1190_v22 }
 0x4b1   :  { %1582 = vmatmul.mubr.msk.f32.vlgmr.msra.gmra.mxu1 %vm1258_vm13, %v2143_v19  ;;  %1348 = vmatpush1.msra.mxu0 %v1187_v17 }
 0x4b2   :  { %1419 = vmatpush1.msra.mxu1 %v1189_v63  ;;  %v1044_v27 = vpop.permute.xlu0 %1043  ;;  %v1134_v38 = vpop.permute.xlu1 %1133  ;;  %1468 = vmatprep.mubr.f32.mxu1 %v1620_v10 }
 0x4b3   :  { %1420 = vmatprep.subr.mxu1 %v1144_v31  ;;  %v1143_v2 = vsel %vm341_vm2, %v1134_v38, %v1136_v60  ;;  %v1142_v21 = vsel %vm341_vm2, %v2104_v41, %v1134_v38  ;;  %v1052_v20 = vsel %vm252_vm5, %v1044_v27, %v2090_v28 }
 0x4b4   :  { %1349 = vmatprep.subr.mxu0 %v1142_v21  ;;  %1421 = vmatpush1.msra.mxu1 %v1143_v2 }
 0x4b5   :  { %1350 = vmatpush1.msra.mxu0 %v1141_v37  ;;  %1422 = vmatprep.subr.mxu1 %v1098_v24 }
 0x4b6   :  { %v902_v23 = vpop.permute.xlu0 %901  ;;  %v1088_v40 = vpop.permute.xlu1 %1087 }
 0x4b7   :  { %v1097_v10 = vsel %vm296_vm1, %v1088_v40, %v1090_v11  ;;  %v1096_v42 = vsel %vm296_vm1, %v2109_v46, %v1088_v40  ;;  %v1049_v46 = vsel %vm252_vm5, %v2086_v25, %v2119_v56 }
 0x4b8   :  { %1351 = vmatprep.subr.mxu0 %v1096_v42  ;;  %1423 = vmatpush1.msra.mxu1 %v1097_v10 }
 0x4b9   :  { %1352 = vmatpush1.msra.mxu0 %v1095_v43  ;;  %1424 = vmatprep.subr.mxu1 %v1052_v20 }
 0x4ba   :  { %v998_v26 = vpop.permute.xlu0 %997  ;;  %v1042_v41 = vpop.permute.xlu1 %1041 }
 0x4bb   :  { %v1051_v45 = vsel %vm252_vm5, %v1042_v41, %v1044_v27  ;;  %v1050_v48 = vsel %vm252_vm5, %v2119_v56, %v1042_v41  ;;  %v1006_v49 = vsel %vm207_vm4, %v998_v26, %v2094_v30 }
 0x4bc   :  { %1353 = vmatprep.subr.mxu0 %v1050_v48  ;;  %1425 = vmatpush1.msra.mxu1 %v1051_v45 }
 0x4bd   :  { %1354 = vmatpush1.msra.mxu0 %v1049_v46  ;;  %1426 = vmatprep.subr.mxu1 %v1006_v49 }
 0x4be   :  { %v856_v28 = vpop.permute.xlu0 %855  ;;  %v996_v47 = vpop.permute.xlu1 %995 }
 0x4bf   :  { %v1005_v52 = vsel %vm207_vm4, %v996_v47, %v998_v26  ;;  %v1004_v53 = vsel %vm207_vm4, %v2129_v4, %v996_v47  ;;  %v911_v4 = vsel %vm118_vm6, %v2131_v5, %v902_v23  ;;  %v865_v7 = vsel %vm74_vm8, %v2098_v33, %v856_v28 }
 0x4c0   :  { %1355 = vmatprep.subr.mxu0 %v1004_v53  ;;  %1427 = vmatpush1.msra.mxu1 %v1005_v52 }
 0x4c1   :  { %1356 = vmatpush1.msra.mxu0 %v1003_v54 }
 0x4c2   :  { %v952_v30 = vpop.permute.xlu0 %951  ;;  %v950_v25 = vpop.permute.xlu1 %949 }
 0x4c3   :  { %v959_v55 = vsel %vm163_vm7, %v950_v25, %v952_v30  ;;  %v958_v56 = vsel %vm163_vm7, %v948_v15, %v950_v25  ;;  %v960_v58 = vsel %vm163_vm7, %v952_v30, %v2096_v32 }
 0x4c4   :  { %1357 = vmatprep.subr.mxu0 %v958_v56  ;;  %1428 = vmatprep.subr.mxu1 %v960_v58 }
 0x4c5   :  { %1358 = vmatpush1.msra.mxu0 %v957_v59  ;;  %1429 = vmatpush1.msra.mxu1 %v959_v55 }
 0x4c6   :  { %v906_v57 = vpop.permute.xlu0 %905  ;;  %v904_v60 = vpop.permute.xlu1 %903 }
 0x4c7   :  { %v913_v61 = vsel %vm118_vm6, %v904_v60, %v906_v57  ;;  %v912_v62 = vsel %vm118_vm6, %v902_v23, %v904_v60  ;;  %v914_v0 = vsel %vm118_vm6, %v906_v57, %v2100_v36 }
 0x4c8   :  { %1359 = vmatprep.subr.mxu0 %v912_v62  ;;  %1430 = vmatprep.subr.mxu1 %v914_v0  ;;  %v1476_v62 = vld [vmem:[%s2256_s7] sm:$0xf] }
 0x4c9   :  { %1360 = vmatpush1.msra.mxu0 %v911_v4  ;;  %1431 = vmatpush1.msra.mxu1 %v913_v61 }
 0x4ca   :  { %v858_v29 = vpop.permute.xlu1 %857  ;;  %v860_v9 = vpop.permute.xlu0 %859 }
 0x4cb   :  { %v866_v32 = vsel %vm74_vm8, %v856_v28, %v858_v29  ;;  %v867_v5 = vsel %vm74_vm8, %v858_v29, %v860_v9 }
 0x4cc   :  { %1361 = vmatprep.subr.mxu0 %v866_v32  ;;  %v1475_v32 = vld [vmem:[%s2257_s6] sm:$0xf] }
 0x4cd   :  { %1362 = vmatpush1.msra.mxu0 %v865_v7 }
 0x4ce   :  { %1363 = vmatprep.subr.mxu0 %v1971_v1  ;;  %v862_v11 = vpop.permute.xlu1 %861 }
 0x4cf   :  { %1364 = vmatpush1.msra.mxu0 %v1964_v3  ;;  %v868_v36 = vsel %vm74_vm8, %v860_v9, %v862_v11 }
 0x4d0   :  { %1583 = vmatmul.mubr.msk.f32.vlgmr.msra.gmra.mxu0 %vm1258_vm13, %v2143_v19  ;;  %1432 = vmatprep.subr.mxu1 %v868_v36 }
 0x4d1   :  { %1433 = vmatpush1.msra.mxu1 %v867_v5 }
 0x4d2   :  { %1434 = vmatprep.subr.mxu1 %v1985_v8 }
 0x4d3   :  { %1435 = vmatpush1.msra.mxu1 %v1978_v6 }
 0x4d4   :  { %1584 = vmatmul.mubr.msk.f32.vlgmr.msra.gmra.mxu1 %vm1258_vm13, %v2143_v19 }
 0x571   :  { %v1328_v1 = vpop.f32.mrf.mxu1 }
 0x572   :  { %v1477_v3 = vmul.f32 %v1328_v1, %v1919_v34 }
 0x573   :  { %v1330_v33 = vpop.f32.mrf.mxu1 }
 0x574   :  { %v1478_v12 = vmul.f32 %v1330_v33, %v1921_v35  ;;  %v1483_v13 = vsel %vm439_vm3, %v1477_v3, 0.0 }
 0x576   :  { %v1484_v14 = vsel %vm439_vm3, %v1478_v12, 0.0 }
 0x577   :  { %v1485_v17 = vadd.f32 %v1484_v14, %v1483_v13 }
 0x590   :  { %v1399_v15 = vpop.f32.mrf.mxu0 }
 0x591   :  { %v1479_v16 = vmul.f32 %v1399_v15, %v1925_v39 }
 0x592   :  { %v1401_v8 = vpop.f32.mrf.mxu0 }
 0x593   :  { %v1486_v6 = vsel %vm439_vm3, %v1479_v16, 0.0  ;;  %v1480_v18 = vmul.f32 %v1401_v8, %v1928_v44 }
 0x594   :  { %v1487_v19 = vadd.f32 %v1486_v6, %v1485_v17  ;;  %v1470_v22 = vpop.f32.mrf.mxu1 }
 0x595   :  { %v1488_v63 = vsel %vm439_vm3, %v1480_v18, 0.0  ;;  %v1481_v27 = vmul.f32 %v1470_v22, %v1931_v50 }
 0x596   :  { %v1489_v31 = vadd.f32 %v1488_v63, %v1487_v19  ;;  %v1472_v38 = vpop.f32.mrf.mxu1 }
 0x597   :  { %v1490_v2 = vsel %vm439_vm3, %v1481_v27, 0.0  ;;  %v1482_v21 = vmul.f32 %v1472_v38, %v1933_v51 }
 0x598   :  { %v1491_v37 = vadd.f32 %v1490_v2, %v1489_v31 }
 0x599   :  { %v1492_v24 = vsel %vm439_vm3, %v1482_v21, 0.0 }
 0x59a   :  { %v1493_v23 = vadd.f32 %v1492_v24, %v1491_v37 }
 0x59c   :  { %1494 = vadd.xlane.f32.xlu0 %v1493_v23 }
 0x625   :  { %v1495_v40 = vpop.xlane.xlu0 %1494 }
 0x626   :  { %v1496_v10 = vmul.f32 0.001953125, %v1495_v40 }
 0x628   :  { %v1497_v42 = vsub.f32 %v1328_v1, %v1496_v10  ;;  %v1498_v43 = vsub.f32 %v1330_v33, %v1496_v10  ;;  %v1499_v20 = vsub.f32 %v1399_v15, %v1496_v10  ;;  %v1500_v26 = vsub.f32 %v1401_v8, %v1496_v10 }
 0x629   :  { %v1501_v41 = vsub.f32 %v1470_v22, %v1496_v10  ;;  %v1502_v45 = vsub.f32 %v1472_v38, %v1496_v10 }
 0x62a   :  { %v1503_v48 = vmul.f32 %v1497_v42, %v1919_v34  ;;  %v1504_v49 = vmul.f32 %v1498_v43, %v1921_v35  ;;  %v1505_v46 = vmul.f32 %v1499_v20, %v1925_v39  ;;  %v1506_v28 = vmul.f32 %v1500_v26, %v1928_v44 }
 0x62b   :  { %v1507_v47 = vmul.f32 %v1501_v41, %v1931_v50  ;;  %v1508_v30 = vmul.f32 %v1502_v45, %v1933_v51 }
 0x62c   :  { %v1509_v52 = vmul.f32 %v1503_v48, %v1503_v48  ;;  %v1510_v53 = vmul.f32 %v1504_v49, %v1504_v49  ;;  %v1511_v54 = vmul.f32 %v1505_v46, %v1505_v46  ;;  %v1512_v25 = vmul.f32 %v1506_v28, %v1506_v28 }
 0x62d   :  { %v1513_v34 = vmul.f32 %v1507_v47, %v1507_v47  ;;  %v1514_v39 = vmul.f32 %v1508_v30, %v1508_v30 }
 0x62e   :  { %v1515_v55 = vsel %vm439_vm3, %v1509_v52, 0.0  ;;  %v1516_v56 = vsel %vm439_vm3, %v1510_v53, 0.0  ;;  %v1518_v35 = vsel %vm439_vm3, %v1511_v54, 0.0  ;;  %v1520_v44 = vsel %vm439_vm3, %v1512_v25, 0.0 }
 0x62f   :  { %v1517_v58 = vadd.f32 %v1516_v56, %v1515_v55  ;;  %v1522_v50 = vsel %vm439_vm3, %v1513_v34, 0.0  ;;  %v1524_v61 = vsel %vm439_vm3, %v1514_v39, 0.0 }
 0x631   :  { %v1519_v59 = vadd.f32 %v1518_v35, %v1517_v58 }
 0x633   :  { %v1521_v57 = vadd.f32 %v1520_v44, %v1519_v59 }
 0x635   :  { %v1523_v60 = vadd.f32 %v1522_v50, %v1521_v57 }
 0x637   :  { %v1525_v51 = vadd.f32 %v1524_v61, %v1523_v60 }
 0x639   :  { %1526 = vadd.xlane.f32.xlu1 %v1525_v51 }
 0x64a   :  { %1545 = vperm.xlu1 %1597, %v1476_v62  }
 0x6c2   :  { %v1527_v0 = vpop.xlane.xlu1 %1526 }
 0x6c3   :  { %v1528_v4 = vmul.f32 0.001953125, %v1527_v0 }
 0x6c5   :  { %v1529_v29 = vadd.f32 1e-05, %v1528_v4 }
 0x6c6   :  { %v1546_v3 = vpop.permute.xlu1 %1545 }
 0x6c7   :  { %1610 = vrsqrt.f32 %v1529_v29 }
 0x6d4   :  { %v1611_v7 = vpop.eup %1610 }
 0x6d5   :  { %v1531_v9 = vmul.f32 %v1611_v7, %v1475_v32 }
 0x6d7   :  { %1534 = vperm.xlu0 %1596, %v1531_v9  }
 0x752   :  { %v1535_v11 = vpop.permute.xlu0 %1534 }
 0x753   :  { %v1537_v36 = vmul.f32 %v1535_v11, %v1503_v48  ;;  %v1538_v5 = vmul.f32 %v1535_v11, %v1504_v49  ;;  %v1539_v1 = vmul.f32 %v1535_v11, %v1505_v46  ;;  %v1540_v33 = vmul.f32 %v1535_v11, %v1506_v28 }
 0x754   :  { %v1541_v12 = vmul.f32 %v1535_v11, %v1507_v47  ;;  %v1542_v13 = vmul.f32 %v1535_v11, %v1508_v30 }
 0x755   :  { %v1548_v14 = vadd.f32 %v1546_v3, %v1537_v36  ;;  %v1549_v15 = vadd.f32 %v1546_v3, %v1538_v5  ;;  %v1550_v16 = vadd.f32 %v1546_v3, %v1539_v1  ;;  %v1551_v17 = vadd.f32 %v1546_v3, %v1540_v33 }
 0x756   :  { %v1552_v8 = vadd.f32 %v1546_v3, %v1541_v12  ;;  %v1553_v6 = vadd.f32 %v1546_v3, %v1542_v13 }
 0x757   :  { %v1560_v18 = vcombine.low %v1548_v14, %v1549_v15  ;;  %v1561_v19 = vcombine.low %v1550_v16, %v1551_v17 }
 0x758   :  { %v1562_v22 = vcombine.low %v1552_v8, %v1553_v6 }
 0x759   :  { %1566 = vst [vmem:[%s2258_s8] sm:$0xff] %v1560_v18  ;;  %1567 = vst [vmem:[%s2258_s8 + $0x8] sm:$0xff] %v1561_v19 }
 0x75a   :  { %1568 = vst [vmem:[%s2258_s8 + $0x10] sm:$0xff] %v1562_v22 }

</bundles_post_ra>
